<compile_context>
chip_gen: v6e
topology: v6e:2x2x1
jax: 0.10.0
libtpu: 0.0.40
codegen_flags: <defaults>
</compile_context>

<pallas_src>
import functools

import numpy as np

import jax
import jax.numpy as jnp
from jax import lax
from jax.experimental import pallas as pl
from jax.experimental.pallas import tpu as pltpu

IMG_H = 28          # the module's Flatten(3*3*32) requires a 28x28 input
IMG_W = 28
ROW = 128           # lane-dense width of every conv-activation spatial row


def _round_up(x, m):
    return (x + m - 1) // m * m


# ---------------------------------------------------------------------------
# One-time weight packing (host-side numpy; NOT in the forward path)
# ---------------------------------------------------------------------------
def _conv_band_matrix(w_oihw, in_w, pad_w, stride, in_row_stride, out_row_stride):
    """Banded conv matrix mapping a 3-row input band to one output row.

    Input band layout:  position di*in_row_stride + ic*in_w + ix   (di = kernel row)
    Output row layout:  position oc*out_w + ox
    so that   out_row(oy) = band(rows 2*oy .. 2*oy+2 of the padded input) @ B.
    """
    w = np.asarray(w_oihw, np.float32)
    oc_n, ic_n, kh, kw = w.shape
    out_w = (in_w + 2 * pad_w - kw) // stride + 1
    b = np.zeros((kh * in_row_stride, out_row_stride), np.float32)
    ic_idx = np.arange(ic_n)
    for oc in range(oc_n):
        for ox in range(out_w):
            col = oc * out_w + ox
            for di in range(kh):
                for dj in range(kw):
                    ix = stride * ox + dj - pad_w
                    if 0 <= ix < in_w:
                        b[di * in_row_stride + ic_idx * in_w + ix, col] += w[oc, :, di, dj]
    return b, out_w


def _bias_row(bias_per_channel, out_w, out_row_stride):
    row = np.zeros((out_row_stride,), np.float32)
    for oc, v in enumerate(np.asarray(bias_per_channel, np.float32)):
        row[oc * out_w:(oc + 1) * out_w] = v
    return row


def pack_params(params, *, eps=1e-5, matmul_dtype=jnp.bfloat16):
    """Fold convs / BN / biases into 5 small (matrix, bias-row) pairs."""
    f32 = np.float32

    # conv1: 1->8 ch, 28x28 -> 14x14, stride 2, pad 1.   B1: [3*28, 128]
    b1m, w1_out = _conv_band_matrix(params["w1"], in_w=IMG_W, pad_w=1, stride=2,
                                    in_row_stride=IMG_W, out_row_stride=ROW)
    b1v = _bias_row(params["b1"], w1_out, ROW)

    # conv2 (+ BatchNorm2d, inference): 8->16 ch, 14x14 -> 7x7.   B2: [3*128, 128]
    b2m, w2_out = _conv_band_matrix(params["w2"], in_w=14, pad_w=1, stride=2,
                                    in_row_stride=ROW, out_row_stride=ROW)
    gamma = np.asarray(params["bn_gamma"], f32)
    beta = np.asarray(params["bn_beta"], f32)
    mean = np.asarray(params["bn_mean"], f32)
    var = np.asarray(params["bn_var"], f32)
    s = gamma / np.sqrt(var + eps)
    b2m = b2m * _bias_row(s, w2_out, ROW)[None, :]          # fold BN scale into columns
    b2v = _bias_row((np.asarray(params["b2"], f32) - mean) * s + beta, w2_out, ROW)

    # conv3: 16->32 ch, 7x7 -> 3x3, stride 2, pad 0.   B3: [3*128, 128]
    b3m, w3_out = _conv_band_matrix(params["w3"], in_w=7, pad_w=0, stride=2,
                                    in_row_stride=ROW, out_row_stride=ROW)
    b3v = _bias_row(params["b3"], w3_out, ROW)

    # linear1: permute torch (c,h,w) flatten -> our conv3 row layout (h, c*3+w),
    # with rows padded to 3*128.
    lw1 = np.asarray(params["lw1"], f32)                    # [128, 288]
    l1 = np.zeros((3 * ROW, 128), f32)
    src = np.arange(32 * 3 * 3)
    c, rem = np.divmod(src, 9)
    h, w_ = np.divmod(rem, 3)
    l1[h * ROW + c * 3 + w_, :] = lw1.T[src, :]
    lb1 = np.asarray(params["lb1"], f32)

    # linear2: lane-dense output (pad encoded dim up to a multiple of 128)
    lw2 = np.asarray(params["lw2"], f32)                    # [enc, 128]
    enc = lw2.shape[0]
    n_out = _round_up(enc, 128)
    l2 = np.zeros((128, n_out), f32)
    l2[:, :enc] = lw2.T
    lb2 = np.zeros((n_out,), f32)
    lb2[:enc] = np.asarray(params["lb2"], f32)

    def mat(a):
        return jnp.asarray(a, dtype=matmul_dtype)

    def vec(a):
        return jnp.asarray(a, dtype=jnp.float32).reshape(1, -1)

    return dict(
        w1=mat(b1m), b1=vec(b1v),
        w2=mat(b2m), b2=vec(b2v),
        w3=mat(b3m), b3=vec(b3v),
        w4=mat(l1), b4=vec(lb1),
        w5=mat(l2), b5=vec(lb2),
    )


# ---------------------------------------------------------------------------
# Fused Pallas kernel: 3 banded convs + 2 linears per batch tile
# ---------------------------------------------------------------------------
def _encoder_kernel(x_ref, w1_ref, b1_ref, w2_ref, b2_ref, w3_ref, b3_ref,
                    w4_ref, b4_ref, w5_ref, b5_ref, o_ref):
    bf16 = jnp.bfloat16

    def conv_rows(h, w, b, n_out_rows, in_row_w, lead_pad_row):
        # h: [bt, n_in_rows * in_row_w]  (row-major spatial rows, bf16).
        # Output row oy reads the 3 consecutive input rows starting at 2*oy
        # (a contiguous static lane slice) and multiplies by the banded conv
        # matrix w: [3*in_row_w, 128].  f32 accumulate + f32 bias/ReLU epilogue,
        # activations carried in bf16 between layers.
        rows = []
        for oy in range(n_out_rows):
            band = h[:, 2 * oy * in_row_w:(2 * oy + 3) * in_row_w]
            acc = jnp.dot(band, w, preferred_element_type=jnp.float32)
            rows.append(jnp.maximum(acc + b, 0.0).astype(bf16))
        if lead_pad_row:                       # zero row = vertical padding for the next conv
            rows = [jnp.zeros_like(rows[0])] + rows
        return jnp.concatenate(rows, axis=1)

    x = x_ref[...]                                                  # [bt, 29*28] bf16
    h = conv_rows(x, w1_ref[...], b1_ref[...], 14, IMG_W, True)     # conv1+ReLU      -> [bt, 15*128]
    h = conv_rows(h, w2_ref[...], b2_ref[...], 7, ROW, False)       # conv2+BN+ReLU   -> [bt, 7*128]
    h = conv_rows(h, w3_ref[...], b3_ref[...], 3, ROW, False)       # conv3+ReLU      -> [bt, 3*128]

    h = jnp.dot(h, w4_ref[...], preferred_element_type=jnp.float32) + b4_ref[...]
    h = jnp.maximum(h, 0.0).astype(bf16)                            # linear1 + ReLU  -> [bt, 128]
    o_ref[...] = jnp.dot(h, w5_ref[...],
                         preferred_element_type=jnp.float32) + b5_ref[...]   # linear2


@functools.partial(jax.jit, static_argnames=("encoded_space_dim",))
def encoder_forward(x_nchw, packed, encoded_space_dim):
    n = x_nchw.shape[0]
    n_out = packed["w5"].shape[1]

    # Input prep (tiny, XLA side): NCHW -> one leading zero row (conv1 top
    # padding), flattened row-major -> [n, 29*28], cast to bf16 (halves DMA).
    x_img = x_nchw.reshape(n, IMG_H, IMG_W)
    x_img = jnp.pad(x_img, ((0, 0), (1, 0), (0, 0)))
    x2 = x_img.reshape(n, (IMG_H + 1) * IMG_W).astype(jnp.bfloat16)
    in_features = x2.shape[1]

    # Batch tile: multiple of 16 (bf16 sublane packing), capped at 256.
    bt = min(256, _round_up(max(n, 1), 16))
    n_pad = _round_up(n, bt)
    if n_pad != n:
        x2 = jnp.pad(x2, ((0, n_pad - n), (0, 0)))
    num_tiles = n_pad // bt

    weight_inputs = (packed["w1"], packed["b1"], packed["w2"], packed["b2"],
                     packed["w3"], packed["b3"], packed["w4"], packed["b4"],
                     packed["w5"], packed["b5"])
    # Constant block index => weights/biases stay VMEM-resident across the grid.
    weight_specs = [pl.BlockSpec(w.shape, lambda i: (0, 0)) for w in weight_inputs]

    macs = (14 * 3 * IMG_W * ROW + 7 * 3 * ROW * ROW + 3 * 3 * ROW * ROW
            + 3 * ROW * ROW + ROW * n_out)
    weight_bytes = sum(int(np.prod(w.shape)) * w.dtype.itemsize for w in weight_inputs)
    cost = pl.CostEstimate(
        flops=2 * n_pad * macs,
        transcendentals=0,
        bytes_accessed=weight_bytes + x2.size * x2.dtype.itemsize + n_pad * n_out * 4)

    out = pl.pallas_call(
        _encoder_kernel,
        out_shape=jax.ShapeDtypeStruct((n_pad, n_out), jnp.float32),
        grid=(num_tiles,),
        in_specs=[pl.BlockSpec((bt, in_features), lambda i: (i, 0))] + weight_specs,
        out_specs=pl.BlockSpec((bt, n_out), lambda i: (i, 0)),
        compiler_params=pltpu.CompilerParams(
            # "parallel" only when there are enough batch tiles to win on v7x's
            # two TensorCores; small-batch inference keeps a single weight DMA.
            dimension_semantics=("parallel",) if num_tiles >= 4 else ("arbitrary",),
            vmem_limit_bytes=32 * 1024 * 1024,
        ),
        cost_estimate=cost,
    )(x2, *weight_inputs)

    # Drop batch padding and the lane-padding of the encoded dimension.
    return out[:n, :encoded_space_dim]


# ---------------------------------------------------------------------------
# Pure-JAX f32 reference (for the tolerance check requested by the review)
# ---------------------------------------------------------------------------
def encoder_reference(x_nchw, params, eps=1e-5):
    def conv(x, w, b, stride, pad):
        y = lax.conv_general_dilated(x, w, (stride, stride), [(pad, pad), (pad, pad)],
                                     dimension_numbers=("NCHW", "OIHW", "NCHW"))
        return y + b.reshape(1, -1, 1, 1)

    h = jax.nn.relu(conv(x_nchw, params["w1"], params["b1"], 2, 1))
    h = conv(h, params["w2"], params["b2"], 2, 1)
    h = (h - params["bn_mean"].reshape(1, -1, 1, 1)) / jnp.sqrt(
        params["bn_var"].reshape(1, -1, 1, 1) + eps)
    h = h * params["bn_gamma"].reshape(1, -1, 1, 1) + params["bn_beta"].reshape(1, -1, 1, 1)
    h = jax.nn.relu(h)
    h = jax.nn.relu(conv(h, params["w3"], params["b3"], 2, 0))
    h = h.reshape(h.shape[0], -1)                 # torch Flatten: (c, h, w) order
    h = jax.nn.relu(h @ params["lw1"].T + params["lb1"])
    return h @ params["lw2"].T + params["lb2"]


# ---------------------------------------------------------------------------
# Deterministic parameter initialization (shapes from Encoder.__init__)
# ---------------------------------------------------------------------------
def init_params(key, encoded_space_dim):
    ks = jax.random.split(key, 10)

    def u(k, shape, fan_in):
        bound = 1.0 / jnp.sqrt(fan_in)
        return jax.random.uniform(k, shape, jnp.float32, -bound, bound)

    return {
        # conv weights: [OC, IC, KH, KW]
        "w1": u(ks[0], (8, 1, 3, 3), 1 * 9),
        "b1": u(ks[1], (8,), 1 * 9),
        "w2": u(ks[2], (16, 8, 3, 3), 8 * 9),
        "b2": u(ks[3], (16,), 8 * 9),
        "w3": u(ks[4], (32, 16, 3, 3), 16 * 9),
        "b3": u(ks[5], (32,), 16 * 9),
        # BatchNorm2d(16), PyTorch default init
        "bn_gamma": jnp.ones((16,), jnp.float32),
        "bn_beta": jnp.zeros((16,), jnp.float32),
        "bn_mean": jnp.zeros((16,), jnp.float32),
        "bn_var": jnp.ones((16,), jnp.float32),
        # linear weights: [out, in] (PyTorch convention)
        "lw1": u(ks[6], (128, 288), 288),
        "lb1": u(ks[7], (128,), 288),
        "lw2": u(ks[8], (encoded_space_dim, 128), 128),
        "lb2": u(ks[9], (encoded_space_dim,), 128),
    }


if __name__ == "__main__":
    encoded_space_dim = 16
    fc2_input_dim = 128  # unused by Encoder.forward (constructor arg only)

    key = jax.random.PRNGKey(0)
    k_x, k_p = jax.random.split(key)

    # Input must be 28x28 for the 3*3*32 flatten dim to hold.
    x = jax.random.normal(k_x, (2, 1, 28, 28), jnp.float32)  # NCHW, like PyTorch
    params = init_params(k_p, encoded_space_dim)
    packed = pack_params(params)          # one-time weight pre-packing

    out = encoder_forward(x, packed, encoded_space_dim=encoded_space_dim)
    out = jax.block_until_ready(out)
    assert out.shape == (2, encoded_space_dim), out.shape
    assert bool(jnp.all(jnp.isfinite(out)))

    # Tolerance check vs. a pure-JAX f32 reference (bf16 operands across 5
    # chained layers => allow a few 1e-2 of absolute deviation).
    ref = encoder_reference(x, params)
    max_err = float(jnp.max(jnp.abs(out - ref)))
    assert max_err < 5e-2, f"max abs err vs f32 reference: {max_err}"

    print("KERNEL_OK")
</pallas_src>

<mosaic_0001>
module attributes {stable_mosaic.version = 11 : i64} {
  func.func @_encoder_kernel(%arg0: i32, %arg1: memref<16x812xbf16, #tpu.memory_space<vmem>>, %arg2: memref<84x128xbf16, #tpu.memory_space<vmem>>, %arg3: memref<1x128xf32, #tpu.memory_space<vmem>>, %arg4: memref<384x128xbf16, #tpu.memory_space<vmem>>, %arg5: memref<1x128xf32, #tpu.memory_space<vmem>>, %arg6: memref<384x128xbf16, #tpu.memory_space<vmem>>, %arg7: memref<1x128xf32, #tpu.memory_space<vmem>>, %arg8: memref<384x128xbf16, #tpu.memory_space<vmem>>, %arg9: memref<1x128xf32, #tpu.memory_space<vmem>>, %arg10: memref<128x128xbf16, #tpu.memory_space<vmem>>, %arg11: memref<1x128xf32, #tpu.memory_space<vmem>>, %arg12: memref<16x128xf32, #tpu.memory_space<vmem>>) attributes {dimension_semantics = [#tpu.dimension_semantics<arbitrary>], iteration_bounds = array<i64: 1>, scalar_prefetch = 0 : i64, scratch_operands = 0 : i64, tpu.core_type = #tpu.core_type<tc>, window_params = [{transform_indices = @transform_0, window_bounds = array<i64: 16, 812>}, {pipeline_mode = #tpu.pipeline_mode<synchronous>, transform_indices = @transform_1, window_bounds = array<i64: 84, 128>}, {pipeline_mode = #tpu.pipeline_mode<synchronous>, transform_indices = @transform_2, window_bounds = array<i64: 1, 128>}, {pipeline_mode = #tpu.pipeline_mode<synchronous>, transform_indices = @transform_3, window_bounds = array<i64: 384, 128>}, {pipeline_mode = #tpu.pipeline_mode<synchronous>, transform_indices = @transform_4, window_bounds = array<i64: 1, 128>}, {pipeline_mode = #tpu.pipeline_mode<synchronous>, transform_indices = @transform_5, window_bounds = array<i64: 384, 128>}, {pipeline_mode = #tpu.pipeline_mode<synchronous>, transform_indices = @transform_6, window_bounds = array<i64: 1, 128>}, {pipeline_mode = #tpu.pipeline_mode<synchronous>, transform_indices = @transform_7, window_bounds = array<i64: 384, 128>}, {pipeline_mode = #tpu.pipeline_mode<synchronous>, transform_indices = @transform_8, window_bounds = array<i64: 1, 128>}, {pipeline_mode = #tpu.pipeline_mode<synchronous>, transform_indices = @transform_9, window_bounds = array<i64: 128, 128>}, {pipeline_mode = #tpu.pipeline_mode<synchronous>, transform_indices = @transform_10, window_bounds = array<i64: 1, 128>}, {transform_indices = @transform_11, window_bounds = array<i64: 16, 128>}]} {
    %c0 = arith.constant 0 : index
    %c0_0 = arith.constant 0 : index
    %0 = vector.load %arg1[%c0, %c0_0] : memref<16x812xbf16, #tpu.memory_space<vmem>>, vector<16x812xbf16>
    %c0_1 = arith.constant 0 : index
    %c0_2 = arith.constant 0 : index
    %1 = vector.load %arg2[%c0_1, %c0_2] : memref<84x128xbf16, #tpu.memory_space<vmem>>, vector<84x128xbf16>
    %c0_3 = arith.constant 0 : index
    %c0_4 = arith.constant 0 : index
    %2 = vector.load %arg3[%c0_3, %c0_4] : memref<1x128xf32, #tpu.memory_space<vmem>>, vector<1x128xf32>
    %3 = vector.extract_strided_slice %0 {offsets = [0, 0], sizes = [16, 84], strides = [1, 1]} : vector<16x812xbf16> to vector<16x84xbf16>
    %cst = arith.constant dense<0.000000e+00> : vector<16x128xf32>
    %4 = tpu.matmul %3, %1, %cst {dimension_numbers = #tpu.dot_dimension_numbers<[1], [0], [0], [1], [0, 0, 1, 1], [], []>} : vector<16x84xbf16>, vector<84x128xbf16>, vector<16x128xf32> -> vector<16x128xf32>
    %5 = vector.broadcast %2 : vector<1x128xf32> to vector<16x128xf32>
    %6 = arith.addf %4, %5 : vector<16x128xf32>
    %cst_5 = arith.constant 0.000000e+00 : f32
    %7 = vector.broadcast %cst_5 : f32 to vector<16x128xf32>
    %8 = arith.maximumf %6, %7 : vector<16x128xf32>
    %9 = arith.truncf %8 : vector<16x128xf32> to vector<16x128xbf16>
    %10 = vector.extract_strided_slice %0 {offsets = [0, 56], sizes = [16, 84], strides = [1, 1]} : vector<16x812xbf16> to vector<16x84xbf16>
    %cst_6 = arith.constant dense<0.000000e+00> : vector<16x128xf32>
    %11 = tpu.matmul %10, %1, %cst_6 {dimension_numbers = #tpu.dot_dimension_numbers<[1], [0], [0], [1], [0, 0, 1, 1], [], []>} : vector<16x84xbf16>, vector<84x128xbf16>, vector<16x128xf32> -> vector<16x128xf32>
    %12 = vector.broadcast %2 : vector<1x128xf32> to vector<16x128xf32>
    %13 = arith.addf %11, %12 : vector<16x128xf32>
    %cst_7 = arith.constant 0.000000e+00 : f32
    %14 = vector.broadcast %cst_7 : f32 to vector<16x128xf32>
    %15 = arith.maximumf %13, %14 : vector<16x128xf32>
    %16 = arith.truncf %15 : vector<16x128xf32> to vector<16x128xbf16>
    %17 = vector.extract_strided_slice %0 {offsets = [0, 112], sizes = [16, 84], strides = [1, 1]} : vector<16x812xbf16> to vector<16x84xbf16>
    %cst_8 = arith.constant dense<0.000000e+00> : vector<16x128xf32>
    %18 = tpu.matmul %17, %1, %cst_8 {dimension_numbers = #tpu.dot_dimension_numbers<[1], [0], [0], [1], [0, 0, 1, 1], [], []>} : vector<16x84xbf16>, vector<84x128xbf16>, vector<16x128xf32> -> vector<16x128xf32>
    %19 = vector.broadcast %2 : vector<1x128xf32> to vector<16x128xf32>
    %20 = arith.addf %18, %19 : vector<16x128xf32>
    %cst_9 = arith.constant 0.000000e+00 : f32
    %21 = vector.broadcast %cst_9 : f32 to vector<16x128xf32>
    %22 = arith.maximumf %20, %21 : vector<16x128xf32>
    %23 = arith.truncf %22 : vector<16x128xf32> to vector<16x128xbf16>
    %24 = vector.extract_strided_slice %0 {offsets = [0, 168], sizes = [16, 84], strides = [1, 1]} : vector<16x812xbf16> to vector<16x84xbf16>
    %cst_10 = arith.constant dense<0.000000e+00> : vector<16x128xf32>
    %25 = tpu.matmul %24, %1, %cst_10 {dimension_numbers = #tpu.dot_dimension_numbers<[1], [0], [0], [1], [0, 0, 1, 1], [], []>} : vector<16x84xbf16>, vector<84x128xbf16>, vector<16x128xf32> -> vector<16x128xf32>
    %26 = vector.broadcast %2 : vector<1x128xf32> to vector<16x128xf32>
    %27 = arith.addf %25, %26 : vector<16x128xf32>
    %cst_11 = arith.constant 0.000000e+00 : f32
    %28 = vector.broadcast %cst_11 : f32 to vector<16x128xf32>
    %29 = arith.maximumf %27, %28 : vector<16x128xf32>
    %30 = arith.truncf %29 : vector<16x128xf32> to vector<16x128xbf16>
    %31 = vector.extract_strided_slice %0 {offsets = [0, 224], sizes = [16, 84], strides = [1, 1]} : vector<16x812xbf16> to vector<16x84xbf16>
    %cst_12 = arith.constant dense<0.000000e+00> : vector<16x128xf32>
    %32 = tpu.matmul %31, %1, %cst_12 {dimension_numbers = #tpu.dot_dimension_numbers<[1], [0], [0], [1], [0, 0, 1, 1], [], []>} : vector<16x84xbf16>, vector<84x128xbf16>, vector<16x128xf32> -> vector<16x128xf32>
    %33 = vector.broadcast %2 : vector<1x128xf32> to vector<16x128xf32>
    %34 = arith.addf %32, %33 : vector<16x128xf32>
    %cst_13 = arith.constant 0.000000e+00 : f32
    %35 = vector.broadcast %cst_13 : f32 to vector<16x128xf32>
    %36 = arith.maximumf %34, %35 : vector<16x128xf32>
    %37 = arith.truncf %36 : vector<16x128xf32> to vector<16x128xbf16>
    %38 = vector.extract_strided_slice %0 {offsets = [0, 280], sizes = [16, 84], strides = [1, 1]} : vector<16x812xbf16> to vector<16x84xbf16>
    %cst_14 = arith.constant dense<0.000000e+00> : vector<16x128xf32>
    %39 = tpu.matmul %38, %1, %cst_14 {dimension_numbers = #tpu.dot_dimension_numbers<[1], [0], [0], [1], [0, 0, 1, 1], [], []>} : vector<16x84xbf16>, vector<84x128xbf16>, vector<16x128xf32> -> vector<16x128xf32>
    %40 = vector.broadcast %2 : vector<1x128xf32> to vector<16x128xf32>
    %41 = arith.addf %39, %40 : vector<16x128xf32>
    %cst_15 = arith.constant 0.000000e+00 : f32
    %42 = vector.broadcast %cst_15 : f32 to vector<16x128xf32>
    %43 = arith.maximumf %41, %42 : vector<16x128xf32>
    %44 = arith.truncf %43 : vector<16x128xf32> to vector<16x128xbf16>
    %45 = vector.extract_strided_slice %0 {offsets = [0, 336], sizes = [16, 84], strides = [1, 1]} : vector<16x812xbf16> to vector<16x84xbf16>
    %cst_16 = arith.constant dense<0.000000e+00> : vector<16x128xf32>
    %46 = tpu.matmul %45, %1, %cst_16 {dimension_numbers = #tpu.dot_dimension_numbers<[1], [0], [0], [1], [0, 0, 1, 1], [], []>} : vector<16x84xbf16>, vector<84x128xbf16>, vector<16x128xf32> -> vector<16x128xf32>
    %47 = vector.broadcast %2 : vector<1x128xf32> to vector<16x128xf32>
    %48 = arith.addf %46, %47 : vector<16x128xf32>
    %cst_17 = arith.constant 0.000000e+00 : f32
    %49 = vector.broadcast %cst_17 : f32 to vector<16x128xf32>
    %50 = arith.maximumf %48, %49 : vector<16x128xf32>
    %51 = arith.truncf %50 : vector<16x128xf32> to vector<16x128xbf16>
    %52 = vector.extract_strided_slice %0 {offsets = [0, 392], sizes = [16, 84], strides = [1, 1]} : vector<16x812xbf16> to vector<16x84xbf16>
    %cst_18 = arith.constant dense<0.000000e+00> : vector<16x128xf32>
    %53 = tpu.matmul %52, %1, %cst_18 {dimension_numbers = #tpu.dot_dimension_numbers<[1], [0], [0], [1], [0, 0, 1, 1], [], []>} : vector<16x84xbf16>, vector<84x128xbf16>, vector<16x128xf32> -> vector<16x128xf32>
    %54 = vector.broadcast %2 : vector<1x128xf32> to vector<16x128xf32>
    %55 = arith.addf %53, %54 : vector<16x128xf32>
    %cst_19 = arith.constant 0.000000e+00 : f32
    %56 = vector.broadcast %cst_19 : f32 to vector<16x128xf32>
    %57 = arith.maximumf %55, %56 : vector<16x128xf32>
    %58 = arith.truncf %57 : vector<16x128xf32> to vector<16x128xbf16>
    %59 = vector.extract_strided_slice %0 {offsets = [0, 448], sizes = [16, 84], strides = [1, 1]} : vector<16x812xbf16> to vector<16x84xbf16>
    %cst_20 = arith.constant dense<0.000000e+00> : vector<16x128xf32>
    %60 = tpu.matmul %59, %1, %cst_20 {dimension_numbers = #tpu.dot_dimension_numbers<[1], [0], [0], [1], [0, 0, 1, 1], [], []>} : vector<16x84xbf16>, vector<84x128xbf16>, vector<16x128xf32> -> vector<16x128xf32>
    %61 = vector.broadcast %2 : vector<1x128xf32> to vector<16x128xf32>
    %62 = arith.addf %60, %61 : vector<16x128xf32>
    %cst_21 = arith.constant 0.000000e+00 : f32
    %63 = vector.broadcast %cst_21 : f32 to vector<16x128xf32>
    %64 = arith.maximumf %62, %63 : vector<16x128xf32>
    %65 = arith.truncf %64 : vector<16x128xf32> to vector<16x128xbf16>
    %66 = vector.extract_strided_slice %0 {offsets = [0, 504], sizes = [16, 84], strides = [1, 1]} : vector<16x812xbf16> to vector<16x84xbf16>
    %cst_22 = arith.constant dense<0.000000e+00> : vector<16x128xf32>
    %67 = tpu.matmul %66, %1, %cst_22 {dimension_numbers = #tpu.dot_dimension_numbers<[1], [0], [0], [1], [0, 0, 1, 1], [], []>} : vector<16x84xbf16>, vector<84x128xbf16>, vector<16x128xf32> -> vector<16x128xf32>
    %68 = vector.broadcast %2 : vector<1x128xf32> to vector<16x128xf32>
    %69 = arith.addf %67, %68 : vector<16x128xf32>
    %cst_23 = arith.constant 0.000000e+00 : f32
    %70 = vector.broadcast %cst_23 : f32 to vector<16x128xf32>
    %71 = arith.maximumf %69, %70 : vector<16x128xf32>
    %72 = arith.truncf %71 : vector<16x128xf32> to vector<16x128xbf16>
    %73 = vector.extract_strided_slice %0 {offsets = [0, 560], sizes = [16, 84], strides = [1, 1]} : vector<16x812xbf16> to vector<16x84xbf16>
    %cst_24 = arith.constant dense<0.000000e+00> : vector<16x128xf32>
    %74 = tpu.matmul %73, %1, %cst_24 {dimension_numbers = #tpu.dot_dimension_numbers<[1], [0], [0], [1], [0, 0, 1, 1], [], []>} : vector<16x84xbf16>, vector<84x128xbf16>, vector<16x128xf32> -> vector<16x128xf32>
    %75 = vector.broadcast %2 : vector<1x128xf32> to vector<16x128xf32>
    %76 = arith.addf %74, %75 : vector<16x128xf32>
    %cst_25 = arith.constant 0.000000e+00 : f32
    %77 = vector.broadcast %cst_25 : f32 to vector<16x128xf32>
    %78 = arith.maximumf %76, %77 : vector<16x128xf32>
    %79 = arith.truncf %78 : vector<16x128xf32> to vector<16x128xbf16>
    %80 = vector.extract_strided_slice %0 {offsets = [0, 616], sizes = [16, 84], strides = [1, 1]} : vector<16x812xbf16> to vector<16x84xbf16>
    %cst_26 = arith.constant dense<0.000000e+00> : vector<16x128xf32>
    %81 = tpu.matmul %80, %1, %cst_26 {dimension_numbers = #tpu.dot_dimension_numbers<[1], [0], [0], [1], [0, 0, 1, 1], [], []>} : vector<16x84xbf16>, vector<84x128xbf16>, vector<16x128xf32> -> vector<16x128xf32>
    %82 = vector.broadcast %2 : vector<1x128xf32> to vector<16x128xf32>
    %83 = arith.addf %81, %82 : vector<16x128xf32>
    %cst_27 = arith.constant 0.000000e+00 : f32
    %84 = vector.broadcast %cst_27 : f32 to vector<16x128xf32>
    %85 = arith.maximumf %83, %84 : vector<16x128xf32>
    %86 = arith.truncf %85 : vector<16x128xf32> to vector<16x128xbf16>
    %87 = vector.extract_strided_slice %0 {offsets = [0, 672], sizes = [16, 84], strides = [1, 1]} : vector<16x812xbf16> to vector<16x84xbf16>
    %cst_28 = arith.constant dense<0.000000e+00> : vector<16x128xf32>
    %88 = tpu.matmul %87, %1, %cst_28 {dimension_numbers = #tpu.dot_dimension_numbers<[1], [0], [0], [1], [0, 0, 1, 1], [], []>} : vector<16x84xbf16>, vector<84x128xbf16>, vector<16x128xf32> -> vector<16x128xf32>
    %89 = vector.broadcast %2 : vector<1x128xf32> to vector<16x128xf32>
    %90 = arith.addf %88, %89 : vector<16x128xf32>
    %cst_29 = arith.constant 0.000000e+00 : f32
    %91 = vector.broadcast %cst_29 : f32 to vector<16x128xf32>
    %92 = arith.maximumf %90, %91 : vector<16x128xf32>
    %93 = arith.truncf %92 : vector<16x128xf32> to vector<16x128xbf16>
    %94 = vector.extract_strided_slice %0 {offsets = [0, 728], sizes = [16, 84], strides = [1, 1]} : vector<16x812xbf16> to vector<16x84xbf16>
    %cst_30 = arith.constant dense<0.000000e+00> : vector<16x128xf32>
    %95 = tpu.matmul %94, %1, %cst_30 {dimension_numbers = #tpu.dot_dimension_numbers<[1], [0], [0], [1], [0, 0, 1, 1], [], []>} : vector<16x84xbf16>, vector<84x128xbf16>, vector<16x128xf32> -> vector<16x128xf32>
    %96 = vector.broadcast %2 : vector<1x128xf32> to vector<16x128xf32>
    %97 = arith.addf %95, %96 : vector<16x128xf32>
    %cst_31 = arith.constant 0.000000e+00 : f32
    %98 = vector.broadcast %cst_31 : f32 to vector<16x128xf32>
    %99 = arith.maximumf %97, %98 : vector<16x128xf32>
    %100 = arith.truncf %99 : vector<16x128xf32> to vector<16x128xbf16>
    %cst_32 = arith.constant 0.000000e+00 : bf16
    %101 = vector.broadcast %cst_32 : bf16 to vector<16x128xbf16>
    %102 = tpu.concatenate %101, %9, %16, %23, %30, %37, %44, %51, %58, %65, %72, %79, %86, %93, %100 in 1 : vector<16x128xbf16>, vector<16x128xbf16>, vector<16x128xbf16>, vector<16x128xbf16>, vector<16x128xbf16>, vector<16x128xbf16>, vector<16x128xbf16>, vector<16x128xbf16>, vector<16x128xbf16>, vector<16x128xbf16>, vector<16x128xbf16>, vector<16x128xbf16>, vector<16x128xbf16>, vector<16x128xbf16>, vector<16x128xbf16> -> vector<16x1920xbf16>
    %c0_33 = arith.constant 0 : index
    %c0_34 = arith.constant 0 : index
    %103 = vector.load %arg4[%c0_33, %c0_34] : memref<384x128xbf16, #tpu.memory_space<vmem>>, vector<384x128xbf16>
    %c0_35 = arith.constant 0 : index
    %c0_36 = arith.constant 0 : index
    %104 = vector.load %arg5[%c0_35, %c0_36] : memref<1x128xf32, #tpu.memory_space<vmem>>, vector<1x128xf32>
    %105 = vector.extract_strided_slice %102 {offsets = [0, 0], sizes = [16, 384], strides = [1, 1]} : vector<16x1920xbf16> to vector<16x384xbf16>
    %cst_37 = arith.constant dense<0.000000e+00> : vector<16x128xf32>
    %106 = tpu.matmul %105, %103, %cst_37 {dimension_numbers = #tpu.dot_dimension_numbers<[1], [0], [0], [1], [0, 0, 1, 1], [], []>} : vector<16x384xbf16>, vector<384x128xbf16>, vector<16x128xf32> -> vector<16x128xf32>
    %107 = vector.broadcast %104 : vector<1x128xf32> to vector<16x128xf32>
    %108 = arith.addf %106, %107 : vector<16x128xf32>
    %cst_38 = arith.constant 0.000000e+00 : f32
    %109 = vector.broadcast %cst_38 : f32 to vector<16x128xf32>
    %110 = arith.maximumf %108, %109 : vector<16x128xf32>
    %111 = arith.truncf %110 : vector<16x128xf32> to vector<16x128xbf16>
    %112 = vector.extract_strided_slice %102 {offsets = [0, 256], sizes = [16, 384], strides = [1, 1]} : vector<16x1920xbf16> to vector<16x384xbf16>
    %cst_39 = arith.constant dense<0.000000e+00> : vector<16x128xf32>
    %113 = tpu.matmul %112, %103, %cst_39 {dimension_numbers = #tpu.dot_dimension_numbers<[1], [0], [0], [1], [0, 0, 1, 1], [], []>} : vector<16x384xbf16>, vector<384x128xbf16>, vector<16x128xf32> -> vector<16x128xf32>
    %114 = vector.broadcast %104 : vector<1x128xf32> to vector<16x128xf32>
    %115 = arith.addf %113, %114 : vector<16x128xf32>
    %cst_40 = arith.constant 0.000000e+00 : f32
    %116 = vector.broadcast %cst_40 : f32 to vector<16x128xf32>
    %117 = arith.maximumf %115, %116 : vector<16x128xf32>
    %118 = arith.truncf %117 : vector<16x128xf32> to vector<16x128xbf16>
    %119 = vector.extract_strided_slice %102 {offsets = [0, 512], sizes = [16, 384], strides = [1, 1]} : vector<16x1920xbf16> to vector<16x384xbf16>
    %cst_41 = arith.constant dense<0.000000e+00> : vector<16x128xf32>
    %120 = tpu.matmul %119, %103, %cst_41 {dimension_numbers = #tpu.dot_dimension_numbers<[1], [0], [0], [1], [0, 0, 1, 1], [], []>} : vector<16x384xbf16>, vector<384x128xbf16>, vector<16x128xf32> -> vector<16x128xf32>
    %121 = vector.broadcast %104 : vector<1x128xf32> to vector<16x128xf32>
    %122 = arith.addf %120, %121 : vector<16x128xf32>
    %cst_42 = arith.constant 0.000000e+00 : f32
    %123 = vector.broadcast %cst_42 : f32 to vector<16x128xf32>
    %124 = arith.maximumf %122, %123 : vector<16x128xf32>
    %125 = arith.truncf %124 : vector<16x128xf32> to vector<16x128xbf16>
    %126 = vector.extract_strided_slice %102 {offsets = [0, 768], sizes = [16, 384], strides = [1, 1]} : vector<16x1920xbf16> to vector<16x384xbf16>
    %cst_43 = arith.constant dense<0.000000e+00> : vector<16x128xf32>
    %127 = tpu.matmul %126, %103, %cst_43 {dimension_numbers = #tpu.dot_dimension_numbers<[1], [0], [0], [1], [0, 0, 1, 1], [], []>} : vector<16x384xbf16>, vector<384x128xbf16>, vector<16x128xf32> -> vector<16x128xf32>
    %128 = vector.broadcast %104 : vector<1x128xf32> to vector<16x128xf32>
    %129 = arith.addf %127, %128 : vector<16x128xf32>
    %cst_44 = arith.constant 0.000000e+00 : f32
    %130 = vector.broadcast %cst_44 : f32 to vector<16x128xf32>
    %131 = arith.maximumf %129, %130 : vector<16x128xf32>
    %132 = arith.truncf %131 : vector<16x128xf32> to vector<16x128xbf16>
    %133 = vector.extract_strided_slice %102 {offsets = [0, 1024], sizes = [16, 384], strides = [1, 1]} : vector<16x1920xbf16> to vector<16x384xbf16>
    %cst_45 = arith.constant dense<0.000000e+00> : vector<16x128xf32>
    %134 = tpu.matmul %133, %103, %cst_45 {dimension_numbers = #tpu.dot_dimension_numbers<[1], [0], [0], [1], [0, 0, 1, 1], [], []>} : vector<16x384xbf16>, vector<384x128xbf16>, vector<16x128xf32> -> vector<16x128xf32>
    %135 = vector.broadcast %104 : vector<1x128xf32> to vector<16x128xf32>
    %136 = arith.addf %134, %135 : vector<16x128xf32>
    %cst_46 = arith.constant 0.000000e+00 : f32
    %137 = vector.broadcast %cst_46 : f32 to vector<16x128xf32>
    %138 = arith.maximumf %136, %137 : vector<16x128xf32>
    %139 = arith.truncf %138 : vector<16x128xf32> to vector<16x128xbf16>
    %140 = vector.extract_strided_slice %102 {offsets = [0, 1280], sizes = [16, 384], strides = [1, 1]} : vector<16x1920xbf16> to vector<16x384xbf16>
    %cst_47 = arith.constant dense<0.000000e+00> : vector<16x128xf32>
    %141 = tpu.matmul %140, %103, %cst_47 {dimension_numbers = #tpu.dot_dimension_numbers<[1], [0], [0], [1], [0, 0, 1, 1], [], []>} : vector<16x384xbf16>, vector<384x128xbf16>, vector<16x128xf32> -> vector<16x128xf32>
    %142 = vector.broadcast %104 : vector<1x128xf32> to vector<16x128xf32>
    %143 = arith.addf %141, %142 : vector<16x128xf32>
    %cst_48 = arith.constant 0.000000e+00 : f32
    %144 = vector.broadcast %cst_48 : f32 to vector<16x128xf32>
    %145 = arith.maximumf %143, %144 : vector<16x128xf32>
    %146 = arith.truncf %145 : vector<16x128xf32> to vector<16x128xbf16>
    %147 = vector.extract_strided_slice %102 {offsets = [0, 1536], sizes = [16, 384], strides = [1, 1]} : vector<16x1920xbf16> to vector<16x384xbf16>
    %cst_49 = arith.constant dense<0.000000e+00> : vector<16x128xf32>
    %148 = tpu.matmul %147, %103, %cst_49 {dimension_numbers = #tpu.dot_dimension_numbers<[1], [0], [0], [1], [0, 0, 1, 1], [], []>} : vector<16x384xbf16>, vector<384x128xbf16>, vector<16x128xf32> -> vector<16x128xf32>
    %149 = vector.broadcast %104 : vector<1x128xf32> to vector<16x128xf32>
    %150 = arith.addf %148, %149 : vector<16x128xf32>
    %cst_50 = arith.constant 0.000000e+00 : f32
    %151 = vector.broadcast %cst_50 : f32 to vector<16x128xf32>
    %152 = arith.maximumf %150, %151 : vector<16x128xf32>
    %153 = arith.truncf %152 : vector<16x128xf32> to vector<16x128xbf16>
    %154 = tpu.concatenate %111, %118, %125, %132, %139, %146, %153 in 1 : vector<16x128xbf16>, vector<16x128xbf16>, vector<16x128xbf16>, vector<16x128xbf16>, vector<16x128xbf16>, vector<16x128xbf16>, vector<16x128xbf16> -> vector<16x896xbf16>
    %c0_51 = arith.constant 0 : index
    %c0_52 = arith.constant 0 : index
    %155 = vector.load %arg6[%c0_51, %c0_52] : memref<384x128xbf16, #tpu.memory_space<vmem>>, vector<384x128xbf16>
    %c0_53 = arith.constant 0 : index
    %c0_54 = arith.constant 0 : index
    %156 = vector.load %arg7[%c0_53, %c0_54] : memref<1x128xf32, #tpu.memory_space<vmem>>, vector<1x128xf32>
    %157 = vector.extract_strided_slice %154 {offsets = [0, 0], sizes = [16, 384], strides = [1, 1]} : vector<16x896xbf16> to vector<16x384xbf16>
    %cst_55 = arith.constant dense<0.000000e+00> : vector<16x128xf32>
    %158 = tpu.matmul %157, %155, %cst_55 {dimension_numbers = #tpu.dot_dimension_numbers<[1], [0], [0], [1], [0, 0, 1, 1], [], []>} : vector<16x384xbf16>, vector<384x128xbf16>, vector<16x128xf32> -> vector<16x128xf32>
    %159 = vector.broadcast %156 : vector<1x128xf32> to vector<16x128xf32>
    %160 = arith.addf %158, %159 : vector<16x128xf32>
    %cst_56 = arith.constant 0.000000e+00 : f32
    %161 = vector.broadcast %cst_56 : f32 to vector<16x128xf32>
    %162 = arith.maximumf %160, %161 : vector<16x128xf32>
    %163 = arith.truncf %162 : vector<16x128xf32> to vector<16x128xbf16>
    %164 = vector.extract_strided_slice %154 {offsets = [0, 256], sizes = [16, 384], strides = [1, 1]} : vector<16x896xbf16> to vector<16x384xbf16>
    %cst_57 = arith.constant dense<0.000000e+00> : vector<16x128xf32>
    %165 = tpu.matmul %164, %155, %cst_57 {dimension_numbers = #tpu.dot_dimension_numbers<[1], [0], [0], [1], [0, 0, 1, 1], [], []>} : vector<16x384xbf16>, vector<384x128xbf16>, vector<16x128xf32> -> vector<16x128xf32>
    %166 = vector.broadcast %156 : vector<1x128xf32> to vector<16x128xf32>
    %167 = arith.addf %165, %166 : vector<16x128xf32>
    %cst_58 = arith.constant 0.000000e+00 : f32
    %168 = vector.broadcast %cst_58 : f32 to vector<16x128xf32>
    %169 = arith.maximumf %167, %168 : vector<16x128xf32>
    %170 = arith.truncf %169 : vector<16x128xf32> to vector<16x128xbf16>
    %171 = vector.extract_strided_slice %154 {offsets = [0, 512], sizes = [16, 384], strides = [1, 1]} : vector<16x896xbf16> to vector<16x384xbf16>
    %cst_59 = arith.constant dense<0.000000e+00> : vector<16x128xf32>
    %172 = tpu.matmul %171, %155, %cst_59 {dimension_numbers = #tpu.dot_dimension_numbers<[1], [0], [0], [1], [0, 0, 1, 1], [], []>} : vector<16x384xbf16>, vector<384x128xbf16>, vector<16x128xf32> -> vector<16x128xf32>
    %173 = vector.broadcast %156 : vector<1x128xf32> to vector<16x128xf32>
    %174 = arith.addf %172, %173 : vector<16x128xf32>
    %cst_60 = arith.constant 0.000000e+00 : f32
    %175 = vector.broadcast %cst_60 : f32 to vector<16x128xf32>
    %176 = arith.maximumf %174, %175 : vector<16x128xf32>
    %177 = arith.truncf %176 : vector<16x128xf32> to vector<16x128xbf16>
    %178 = tpu.concatenate %163, %170, %177 in 1 : vector<16x128xbf16>, vector<16x128xbf16>, vector<16x128xbf16> -> vector<16x384xbf16>
    %c0_61 = arith.constant 0 : index
    %c0_62 = arith.constant 0 : index
    %179 = vector.load %arg8[%c0_61, %c0_62] : memref<384x128xbf16, #tpu.memory_space<vmem>>, vector<384x128xbf16>
    %cst_63 = arith.constant dense<0.000000e+00> : vector<16x128xf32>
    %180 = tpu.matmul %178, %179, %cst_63 {dimension_numbers = #tpu.dot_dimension_numbers<[1], [0], [0], [1], [0, 0, 1, 1], [], []>} : vector<16x384xbf16>, vector<384x128xbf16>, vector<16x128xf32> -> vector<16x128xf32>
    %c0_64 = arith.constant 0 : index
    %c0_65 = arith.constant 0 : index
    %181 = vector.load %arg9[%c0_64, %c0_65] : memref<1x128xf32, #tpu.memory_space<vmem>>, vector<1x128xf32>
    %182 = vector.broadcast %181 : vector<1x128xf32> to vector<16x128xf32>
    %183 = arith.addf %180, %182 : vector<16x128xf32>
    %cst_66 = arith.constant 0.000000e+00 : f32
    %184 = vector.broadcast %cst_66 : f32 to vector<16x128xf32>
    %185 = arith.maximumf %183, %184 : vector<16x128xf32>
    %186 = arith.truncf %185 : vector<16x128xf32> to vector<16x128xbf16>
    %c0_67 = arith.constant 0 : index
    %c0_68 = arith.constant 0 : index
    %187 = vector.load %arg10[%c0_67, %c0_68] : memref<128x128xbf16, #tpu.memory_space<vmem>>, vector<128x128xbf16>
    %cst_69 = arith.constant dense<0.000000e+00> : vector<16x128xf32>
    %188 = tpu.matmul %186, %187, %cst_69 {dimension_numbers = #tpu.dot_dimension_numbers<[1], [0], [0], [1], [0, 0, 1, 1], [], []>} : vector<16x128xbf16>, vector<128x128xbf16>, vector<16x128xf32> -> vector<16x128xf32>
    %c0_70 = arith.constant 0 : index
    %c0_71 = arith.constant 0 : index
    %189 = vector.load %arg11[%c0_70, %c0_71] : memref<1x128xf32, #tpu.memory_space<vmem>>, vector<1x128xf32>
    %190 = vector.broadcast %189 : vector<1x128xf32> to vector<16x128xf32>
    %191 = arith.addf %188, %190 : vector<16x128xf32>
    %c0_72 = arith.constant 0 : index
    %c0_73 = arith.constant 0 : index
    %192 = vector.load %arg12[%c0_72, %c0_73] : memref<16x128xf32, #tpu.memory_space<vmem>>, vector<16x128xf32>
    tpu.vector_store %arg12[%c0_72, %c0_73], %191 {strides = array<i32>} : memref<16x128xf32, #tpu.memory_space<vmem>>, vector<16x128xf32>,
    return
  }
  func.func @transform_0(%arg0: i32) -> (i32, i32) {
    %c0_i32 = arith.constant 0 : i32
    %c0_i32_0 = arith.constant 0 : i32
    return %arg0, %c0_i32 : i32, i32
  }
  func.func @transform_1(%arg0: i32) -> (i32, i32) {
    %c0_i32 = arith.constant 0 : i32
    %c0_i32_0 = arith.constant 0 : i32
    %c0_i32_1 = arith.constant 0 : i32
    return %c0_i32, %c0_i32_0 : i32, i32
  }
  func.func @transform_2(%arg0: i32) -> (i32, i32) {
    %c0_i32 = arith.constant 0 : i32
    %c0_i32_0 = arith.constant 0 : i32
    %c0_i32_1 = arith.constant 0 : i32
    return %c0_i32, %c0_i32_0 : i32, i32
  }
  func.func @transform_3(%arg0: i32) -> (i32, i32) {
    %c0_i32 = arith.constant 0 : i32
    %c0_i32_0 = arith.constant 0 : i32
    %c0_i32_1 = arith.constant 0 : i32
    return %c0_i32, %c0_i32_0 : i32, i32
  }
  func.func @transform_4(%arg0: i32) -> (i32, i32) {
    %c0_i32 = arith.constant 0 : i32
    %c0_i32_0 = arith.constant 0 : i32
    %c0_i32_1 = arith.constant 0 : i32
    return %c0_i32, %c0_i32_0 : i32, i32
  }
  func.func @transform_5(%arg0: i32) -> (i32, i32) {
    %c0_i32 = arith.constant 0 : i32
    %c0_i32_0 = arith.constant 0 : i32
    %c0_i32_1 = arith.constant 0 : i32
    return %c0_i32, %c0_i32_0 : i32, i32
  }
  func.func @transform_6(%arg0: i32) -> (i32, i32) {
    %c0_i32 = arith.constant 0 : i32
    %c0_i32_0 = arith.constant 0 : i32
    %c0_i32_1 = arith.constant 0 : i32
    return %c0_i32, %c0_i32_0 : i32, i32
  }
  func.func @transform_7(%arg0: i32) -> (i32, i32) {
    %c0_i32 = arith.constant 0 : i32
    %c0_i32_0 = arith.constant 0 : i32
    %c0_i32_1 = arith.constant 0 : i32
    return %c0_i32, %c0_i32_0 : i32, i32
  }
  func.func @transform_8(%arg0: i32) -> (i32, i32) {
    %c0_i32 = arith.constant 0 : i32
    %c0_i32_0 = arith.constant 0 : i32
    %c0_i32_1 = arith.constant 0 : i32
    return %c0_i32, %c0_i32_0 : i32, i32
  }
  func.func @transform_9(%arg0: i32) -> (i32, i32) {
    %c0_i32 = arith.constant 0 : i32
    %c0_i32_0 = arith.constant 0 : i32
    %c0_i32_1 = arith.constant 0 : i32
    return %c0_i32, %c0_i32_0 : i32, i32
  }
  func.func @transform_10(%arg0: i32) -> (i32, i32) {
    %c0_i32 = arith.constant 0 : i32
    %c0_i32_0 = arith.constant 0 : i32
    %c0_i32_1 = arith.constant 0 : i32
    return %c0_i32, %c0_i32_0 : i32, i32
  }
  func.func @transform_11(%arg0: i32) -> (i32, i32) {
    %c0_i32 = arith.constant 0 : i32
    %c0_i32_0 = arith.constant 0 : i32
    return %arg0, %c0_i32 : i32, i32
  }
}

</mosaic_0001>

<bundles_post_ra>
// kernel: encoder_forward.1
= control target key start
LH: loop header
LB: loop body
LE: loop exit
PB: predicated region body
PF: predicated region fallthrough
CT: control target
= control target key end

     0   :  { %16 = vsyncpa [#allocation3], 0  ;;  %s4883_s0 = inlined_call_operand.vmem [shape: bf16[16,812], index: 0, kind: input, shape index: {}]   ;;  %s4884_s1 = inlined_call_operand.vmem [shape: bf16[84,128], index: 1, kind: input, shape index: {}]   ;;  %s4885_s2 = inlined_call_operand.vmem [shape: f32[1,128], index: 2, kind: input, shape index: {}]   ;;  %s4886_s3 = inlined_call_operand.vmem [shape: bf16[384,128], index: 3, kind: input, shape index: {}]   ;;  %s4887_s4 = inlined_call_operand.hbm [shape: f32[1,128], index: 4, kind: input, shape index: {}]   ;;  %s4888_s5 = inlined_call_operand.vmem [shape: bf16[384,128], index: 5, kind: input, shape index: {}]   ;;  %s4889_s6 = inlined_call_operand.hbm [shape: f32[1,128], index: 6, kind: input, shape index: {}]   ;;  %s4890_s7 = inlined_call_operand.hbm [shape: bf16[384,128], index: 7, kind: input, shape index: {}]   ;;  %s4891_s8 = inlined_call_operand.hbm [shape: f32[1,128], index: 8, kind: input, shape index: {}]   ;;  %s4892_s9 = inlined_call_operand.hbm [shape: bf16[128,128], index: 9, kind: input, shape index: {}]   ;;  %s4893_s10 = inlined_call_operand.hbm [shape: f32[1,128], index: 10, kind: input, shape index: {}]   ;;  %s4894_s11 = inlined_call_operand.vmem [shape: f32[16,128], index: 11, kind: output, shape index: {}]  }
   0x1   :  { %17 = vsyncpa [#allocation5], 0 }
   0x2   :  { %18 = vsyncpa [#allocation8], 0 }
   0x3   :  { %19 = vsyncpa [#allocation11], 0  ;;  %s3851_s17 = smov [#allocation4]   ;;  %s3852_s19 = smov [#allocation7]  }
   0x4   :  { %s46_s18 = sshll.u32 %s3851_s17, 4  ;;  %s68_s20 = sshll.u32 %s3852_s19, 4  ;;  %s47_s18 = int_to_ptr.vmem [resolvable:$true] %s46_s18  ;;  %s69_s20 = int_to_ptr.vmem [resolvable:$true] %s68_s20 }
   0x5   :  { %s3731_s21 = scalar_lea.vmem %s47_s18, 16  ;;  %s3735_s22 = scalar_lea.vmem %s47_s18, 32 }
   0x6   :  { %p3732_p0 = scmp.ne.s32.totalorder %s47_s18, %s3731_s21  ;;  %p3736_p1 = scmp.lt.s32.totalorder %s47_s18, %s47_s18 }
   0x7   :  { %p3737_p2 = scmp.lt.s32.totalorder %s3735_s22, %s3731_s21 }
   0x9   :  { %p3738_p3 = por %p3737_p2, %p3736_p1 }
   0xb   :  { %p3739_p4 = pnand %p3738_p3, %p3732_p0 }
   0xd   :  { %3742 = shalt.err (!%p3739_p4)
}
   0xe   :  { %49 = dma.hbm_to_vmem [thread:$0]  %s4889_s6, 16, %s47_s18, [#allocation5]  }
   0xf   :  { %s3751_s25 = scalar_lea.vmem %s69_s20, 16  ;;  %s3755_s26 = scalar_lea.vmem %s69_s20, 32 }
  0x10   :  { %p3752_p5 = scmp.ne.s32.totalorder %s69_s20, %s3751_s25  ;;  %p3756_p6 = scmp.lt.s32.totalorder %s69_s20, %s69_s20 }
  0x11   :  { %p3757_p7 = scmp.lt.s32.totalorder %s3755_s26, %s3751_s25 }
  0x13   :  { %p3758_p8 = por %p3757_p7, %p3756_p6 }
  0x15   :  { %p3759_p9 = pnand %p3758_p8, %p3752_p5 }
  0x17   :  { %3762 = shalt.err (!%p3759_p9)
}
  0x18   :  { %71 = dma.hbm_to_vmem [thread:$0]  %s4891_s8, 16, %s69_s20, [#allocation8]  }
  0x19   :  { %s3853_s29 = smov [#allocation2]   ;;  %s3854_s12 = smov [#allocation6]  }
  0x1a   :  { %s34_s30 = sshll.u32 %s3853_s29, 4  ;;  %s55_s13 = sshll.u32 %s3854_s12, 4  ;;  %s35_s30 = int_to_ptr.vmem [resolvable:$true] %s34_s30  ;;  %s56_s13 = int_to_ptr.vmem [resolvable:$true] %s55_s13 }
  0x1b   :  { %s3771_s14 = scalar_lea.vmem %s35_s30, 16  ;;  %s3775_s6 = scalar_lea.vmem %s35_s30, 32 }
  0x1c   :  { %p3772_p10 = scmp.ne.s32.totalorder %s35_s30, %s3771_s14  ;;  %p3776_p11 = scmp.lt.s32.totalorder %s35_s30, %s35_s30 }
  0x1d   :  { %p3777_p12 = scmp.lt.s32.totalorder %s3775_s6, %s3771_s14 }
  0x1f   :  { %p3778_p13 = por %p3777_p12, %p3776_p11 }
  0x21   :  { %p3779_p0 = pnand %p3778_p13, %p3772_p10 }
  0x23   :  { %3782 = shalt.err (!%p3779_p0)
}
  0x24   :  { %37 = dma.hbm_to_vmem [thread:$0]  %s4887_s4, 16, %s35_s30, [#allocation3]  }
  0x25   :  { %s3791_s17 = scalar_lea.vmem %s56_s13, 3072  ;;  %p3796_p2 = scmp.lt.s32.totalorder %s56_s13, %s56_s13 }
  0x26   :  { %p3792_p1 = scmp.ne.s32.totalorder %s56_s13, %s3791_s17  ;;  %p3797_p3 = scmp.lt.s32.totalorder %s3791_s17, %s3791_s17 }
  0x28   :  { %p3798_p4 = por %p3797_p3, %p3796_p2 }
  0x2a   :  { %p3799_p5 = pnand %p3798_p4, %p3792_p1 }
  0x2c   :  { %3802 = shalt.err (!%p3799_p5)
}
  0x2d   :  { %s3855_s8 = smov 64   ;;  %s3856_s18 = smov 4  }
  0x2e   :  { %61 = dma.hbm_to_vmem [thread:$0]  %s4890_s7, 3072, %s56_s13, [#allocation5], %s3855_s8, %s3855_s8, %s3856_s18  }
  0x2f   :  { %s3857_s21 = smov [#allocation9]   ;;  %s3858_s23 = smov [#allocation10]  }
  0x30   :  { %s77_s22 = sshll.u32 %s3857_s21, 4  ;;  %s90_s24 = sshll.u32 %s3858_s23, 4  ;;  %s78_s22 = int_to_ptr.vmem [resolvable:$true] %s77_s22  ;;  %s91_s24 = int_to_ptr.vmem [resolvable:$true] %s90_s24 }
  0x31   :  { %s3811_s4 = scalar_lea.vmem %s78_s22, 1024  ;;  %p3816_p7 = scmp.lt.s32.totalorder %s78_s22, %s78_s22 }
  0x32   :  { %p3812_p6 = scmp.ne.s32.totalorder %s78_s22, %s3811_s4  ;;  %p3817_p8 = scmp.lt.s32.totalorder %s3811_s4, %s3811_s4 }
  0x34   :  { %p3818_p9 = por %p3817_p8, %p3816_p7 }
  0x36   :  { %p3819_p10 = pnand %p3818_p9, %p3812_p6 }
  0x38   :  { %3822 = shalt.err (!%p3819_p10)
}
  0x39   :  { %83 = dma.hbm_to_vmem [thread:$0]  %s4892_s9, 1024, %s78_s22, [#allocation8], %s3855_s8, %s3855_s8, %s3856_s18  }
  0x3a   :  { %s3831_s7 = scalar_lea.vmem %s91_s24, 16  ;;  %s3835_s27 = scalar_lea.vmem %s91_s24, 32 }
  0x3b   :  { %p3832_p11 = scmp.ne.s32.totalorder %s91_s24, %s3831_s7  ;;  %p3836_p12 = scmp.lt.s32.totalorder %s91_s24, %s91_s24 }
  0x3c   :  { %p3837_p13 = scmp.lt.s32.totalorder %s3835_s27, %s3831_s7 }
  0x3e   :  { %p3838_p0 = por %p3837_p13, %p3836_p12 }
  0x40   :  { %p3839_p1 = pnand %p3838_p0, %p3832_p11 }
  0x42   :  { %3842 = shalt.err (!%p3839_p1)
}
  0x43   :  { %93 = dma.hbm_to_vmem [thread:$0]  %s4893_s10, 16, %s91_s24, [#allocation11]  }
  0x44   :  { %3843 = dma.done.wait [#allocation3], 16  }
  0x45   :  { %3844 = vsyncadd [#allocation3], 4294967280 }
  0x46   :  { %3845 = dma.done.wait [#allocation5], 3088  }
  0x47   :  { %3846 = vsyncadd [#allocation5], 4294964208 }
  0x48   :  { %3847 = dma.done.wait [#allocation8], 1040  }
  0x49   :  { %3848 = vsyncadd [#allocation8], 4294966256 }
  0x4a   :  { %3849 = dma.done.wait [#allocation11], 16  }
  0x4b   :  { %3850 = vsyncadd [#allocation11], 4294967280  ;;  %v3859_v0 = vmov 0.0   ;;  %vm3860_vm0 = vmmov 0   ;;  %v3627_v1 = vld [vmem:[%s4883_s0] ss:$28 sps:$4 sm:$0xff]  }
  0x4c   :  { %3140 = vmatprep.subr.bf16.mxu1 %v3859_v0  ;;  %3172 = vmatprep.subr.bf16.mxu0 %v3859_v0  ;;  %v3629_v2 = vld [vmem:[%s4883_s0 + $0x4] ss:$28 sps:$4 sm:$0xff]   ;;  %s3861_s13 = smov 16   ;;  %s3862_s14 = smov 72   ;;  %vm181_vm1 = vcmask 1041408   ;;  %v3989_v7 = vld [vmem:[%s4884_s1 + $0x18] sm:$0xff]  }
  0x4d   :  { %3152 = vmatprep.mubr.msk.bf16.mxu1 %vm3860_vm0, %v3859_v0  ;;  %3184 = vmatprep.mubr.msk.bf16.mxu0 %vm3860_vm0, %v3859_v0  ;;  %v3633_v3 = vld [vmem:[%s4884_s1 + $0x28] ss:$0 sps:$4 sm:$0x33]   ;;  %v3977_v5 = vld [vmem:[%s4884_s1 + $0x20] sm:$0xff]   ;;  %s3863_s18 = smov 88   ;;  %s3864_s19 = smov 32  }
  0x4e   :  { %285 = vrot.lane.b32.xlu1 %v3627_v1, %s3861_s13  ;;  %232 = vrot.lane.b32.xlu0 %v3627_v1, %s3862_s14  ;;  %v3971_v4 = vsel %vm181_vm1, %v3633_v3, 0  ;;  %v3630_v6 = vld [vmem:[%s4883_s0 + $0x8] ss:$28 sps:$4 sm:$0xff]   ;;  %s3865_s25 = smov 104   ;;  %v4001_v9 = vld [vmem:[%s4884_s1 + $0x10] sm:$0xff]   ;;  %s3866_s29 = smov 48  }
  0x4f   :  { %3141 = vmatpush3.bf16.msra.mxu1 %v3971_v4  ;;  %3173 = vmatpush3.bf16.msra.mxu0 %v3971_v4  ;;  %v3632_v8 = vld [vmem:[%s4883_s0 + $0xc] ss:$28 sps:$4 sm:$0xff]   ;;  %vm177_vm2 = vcmask 687104   ;;  %v4021_v12 = vld [vmem:[%s4884_s1] sm:$0xff]   ;;  %v3641_v13 = vld [vmem:[%s4883_s0 + $0x14] ss:$28 sps:$4 sm:$0xff]  }
  0x50   :  { %3142 = vmatprep.subr.bf16.mxu1 %v3859_v0  ;;  %3174 = vmatprep.subr.bf16.mxu0 %v3859_v0  ;;  %v4009_v10 = vld [vmem:[%s4884_s1 + $0x8] sm:$0xff]   ;;  %s3870_s15 = smov 24   ;;  %v3642_v14 = vld [vmem:[%s4883_s0 + $0x18] ss:$28 sps:$4 sm:$0xff]   ;;  %vm289_vm3 = vcmask 130048   ;;  %vm236_vm4 = vcmask 588800  }
  0x51   :  { %v3639_v11 = vld [vmem:[%s4883_s0 + $0x10] ss:$28 sps:$4 sm:$0xff]   ;;  %vm396_vm5 = vcmask 261120   ;;  %vm501_vm6 = vcmask 392192   ;;  %vm608_vm7 = vcmask 523264   ;;  %vm661_vm8 = vcmask 64512  }
  0x52   :  { %287 = vrot.lane.b32.xlu1 %v3629_v2, %s3861_s13  ;;  %234 = vrot.lane.b32.xlu0 %v3629_v2, %s3862_s14  ;;  %s3867_s13 = smov 120   ;;  %s3868_s14 = smov 8   ;;  %vm717_vm9 = vcmask 654336   ;;  %v4195_v43 = vld [vmem:[%s4885_s2] ss:$0 sm:$0xff]  ;;  %v4210_v47 = vld [vmem:[%s4886_s3 + $0x78] sm:$0xff]  }
  0x53   :  { %3143 = vmatpush3.bf16.msra.mxu1 %v3977_v5  ;;  %3175 = vmatpush3.bf16.msra.mxu0 %v3977_v5  ;;  %vm770_vm10 = vcmask 195584   ;;  %v4217_v53 = vld [vmem:[%s4886_s3 + $0x38] sm:$0xff]   ;;  %v4224_v54 = vld [vmem:[%s4886_s3 + $0x70] sm:$0xff]   ;;  %v4240_v57 = vld [vmem:[%s4886_s3 + $0x68] sm:$0xff]   ;;  %vm877_vm11 = vcmask 326656  }
  0x54   :  { %3144 = vmatprep.subr.bf16.mxu1 %v3859_v0  ;;  %3176 = vmatprep.subr.bf16.mxu0 %v3859_v0  ;;  %v4233_v56 = vld [vmem:[%s4886_s3 + $0x30] sm:$0xff]   ;;  %v4249_v58 = vld [vmem:[%s4886_s3 + $0x28] sm:$0xff]   ;;  %v4256_v59 = vld [vmem:[%s4886_s3 + $0x60] sm:$0xff]  }
  0x55   :  { %v4263_v60 = vld [vmem:[%s4886_s3 + $0x20] sm:$0xff]   ;;  %v4270_v61 = vld [vmem:[%s4886_s3 + $0x58] sm:$0xff]   ;;  %v4284_v63 = vld [vmem:[%s4886_s3 + $0x50] sm:$0xff]  }
  0x56   :  { %338 = vrot.lane.b32.xlu0 %v3629_v2, %s3863_s18  ;;  %392 = vrot.lane.b32.xlu1 %v3629_v2, %s3864_s19  ;;  %s3871_s18 = smov 96   ;;  %v4277_v62 = vld [vmem:[%s4886_s3 + $0x18] sm:$0xff]   ;;  %v4298_v3 = vld [vmem:[%s4886_s3 + $0x48] sm:$0xff]  }
  0x57   :  { %3145 = vmatpush3.bf16.msra.mxu1 %v3989_v7  ;;  %3177 = vmatpush3.bf16.msra.mxu0 %v3989_v7 }
  0x58   :  { %3146 = vmatprep.subr.bf16.mxu1 %v3859_v0  ;;  %3178 = vmatprep.subr.bf16.mxu0 %v3859_v0 }
  0x5a   :  { %394 = vrot.lane.b32.xlu0 %v3630_v6, %s3864_s19  ;;  %445 = vrot.lane.b32.xlu1 %v3630_v6, %s3865_s25  ;;  %s3872_s19 = smov 40  }
  0x5b   :  { %3147 = vmatpush3.bf16.msra.mxu1 %v4001_v9  ;;  %3179 = vmatpush3.bf16.msra.mxu0 %v4001_v9 }
  0x5c   :  { %3148 = vmatprep.subr.bf16.mxu1 %v3859_v0  ;;  %3180 = vmatprep.subr.bf16.mxu0 %v3859_v0 }
  0x5e   :  { %499 = vrot.lane.b32.xlu1 %v3632_v8, %s3866_s29  ;;  %497 = vrot.lane.b32.xlu0 %v3630_v6, %s3866_s29  ;;  %v4305_v6 = vld [vmem:[%s4886_s3 + $0x8] sm:$0xff]  }
  0x5f   :  { %3149 = vmatpush3.bf16.msra.mxu1 %v4009_v10  ;;  %3181 = vmatpush3.bf16.msra.mxu0 %v4009_v10 }
  0x60   :  { %3150 = vmatprep.subr.bf16.mxu1 %v3859_v0  ;;  %3182 = vmatprep.subr.bf16.mxu0 %v3859_v0 }
  0x62   :  { %550 = vrot.lane.b32.xlu0 %v3632_v8, %s3867_s13  ;;  %604 = vrot.lane.b32.xlu1 %v3632_v8, %s3855_s8 }
  0x63   :  { %3151 = vmatpush3.bf16.msra.mxu1 %v4021_v12  ;;  %3183 = vmatpush3.bf16.msra.mxu0 %v4021_v12 }
  0x64   :  { %3156 = vmatprep.subr.bf16.mxu1 %v3859_v0  ;;  %3204 = vmatprep.subr.bf16.mxu0 %v3859_v0 }
  0x66   :  { %606 = vrot.lane.b32.xlu0 %v3639_v11, %s3855_s8  ;;  %657 = vrot.lane.b32.xlu1 %v3632_v8, %s3868_s14  ;;  %s3869_s8 = smov 80   ;;  %v4316_v8 = vld [vmem:[%s4886_s3 + $0x40] sm:$0xff]  }
  0x67   :  { %3153 = vmatmul.mubr.msk.bf16.vlgmr.msra.gmra.mxu1 %vm177_vm2, %v3627_v1  ;;  %v4291_v1 = vld [vmem:[%s4886_s3 + $0x10] sm:$0xff]  }
  0x68   :  { %3157 = vmatpush3.bf16.msra.mxu1 %v3971_v4  ;;  %3168 = vmatprep.mubr.msk.bf16.mxu1 %vm3860_vm0, %v3859_v0 }
  0x69   :  { %3158 = vmatprep.subr.bf16.mxu1 %v3859_v0 }
  0x6a   :  { %659 = vrot.lane.b32.xlu0 %v3639_v11, %s3868_s14  ;;  %713 = vrot.lane.b32.xlu1 %v3639_v11, %s3869_s8 }
  0x6c   :  { %3159 = vmatpush3.bf16.msra.mxu1 %v3977_v5 }
  0x6d   :  { %3160 = vmatprep.subr.bf16.mxu1 %v3859_v0 }
  0x6e   :  { %715 = vrot.lane.b32.xlu0 %v3641_v13, %s3869_s8  ;;  %766 = vrot.lane.b32.xlu1 %v3639_v11, %s3870_s15  ;;  %v4341_v11 = vld [vmem:[%s4886_s3 + $0xa8] sm:$0xff]  }
  0x70   :  { %3161 = vmatpush3.bf16.msra.mxu1 %v3989_v7 }
  0x71   :  { %3162 = vmatprep.subr.bf16.mxu1 %v3859_v0 }
  0x72   :  { %768 = vrot.lane.b32.xlu0 %v3641_v13, %s3870_s15  ;;  %819 = vrot.lane.b32.xlu1 %v3641_v13, %s3871_s18 }
  0x74   :  { %3163 = vmatpush3.bf16.msra.mxu1 %v4001_v9 }
  0x75   :  { %3164 = vmatprep.subr.bf16.mxu1 %v3859_v0 }
  0x76   :  { %873 = vrot.lane.b32.xlu0 %v3641_v13, %s3872_s19  ;;  %875 = vrot.lane.b32.xlu1 %v3642_v14, %s3872_s19  ;;  %v4350_v13 = vld [vmem:[%s4886_s3 + $0xa0] sm:$0xff]   ;;  %v4359_v14 = vld [vmem:[%s4886_s3 + $0x98] sm:$0xff]  }
  0x78   :  { %3165 = vmatpush3.bf16.msra.mxu1 %v4009_v10 }
  0x79   :  { %3166 = vmatprep.subr.bf16.mxu1 %v3859_v0 }
  0x7c   :  { %3167 = vmatpush3.bf16.msra.mxu1 %v4021_v12 }
  0x7d   :  { %3188 = vmatprep.subr.bf16.mxu1 %v3859_v0 }
  0xc0   :  { %v286_v15 = vpop.permute.xlu1 %285  ;;  %v233_v16 = vpop.permute.xlu0 %232 }
  0xc4   :  { %v288_v17 = vpop.permute.xlu1 %287  ;;  %v235_v18 = vpop.permute.xlu0 %234 }
  0xc5   :  { %v290_v19 = vsel %vm289_vm3, %v286_v15, %v288_v17  ;;  %v237_v20 = vsel %vm236_vm4, %v233_v16, %v235_v18  ;;  %v4368_v15 = vld [vmem:[%s4886_s3 + $0x90] sm:$0xff]   ;;  %v4377_v16 = vld [vmem:[%s4886_s3 + $0x88] sm:$0xff]   ;;  %v4386_v17 = vld [vmem:[%s4886_s3 + $0x80] sm:$0xff]  }
  0xc6   :  { %3185 = vmatmul.mubr.msk.bf16.vlgmr.msra.gmra.mxu0 %vm177_vm2, %v290_v19  ;;  %3169 = vmatmul.mubr.msk.bf16.vlgmr.msra.gmra.mxu1 %vm177_vm2, %v237_v20 }
  0xc7   :  { %3189 = vmatpush3.bf16.msra.mxu1 %v3971_v4  ;;  %3205 = vmatpush3.bf16.msra.mxu0 %v3971_v4 }
  0xc8   :  { %3190 = vmatprep.subr.bf16.mxu1 %v3859_v0  ;;  %3206 = vmatprep.subr.bf16.mxu0 %v3859_v0  ;;  %v339_v21 = vpop.permute.xlu0 %338  ;;  %v393_v22 = vpop.permute.xlu1 %392 }
  0xc9   :  { %3200 = vmatprep.mubr.msk.bf16.mxu1 %vm3860_vm0, %v3859_v0  ;;  %3216 = vmatprep.mubr.msk.bf16.mxu0 %vm3860_vm0, %v3859_v0 }
  0xcb   :  { %3191 = vmatpush3.bf16.msra.mxu1 %v3977_v5  ;;  %3207 = vmatpush3.bf16.msra.mxu0 %v3977_v5 }
  0xcc   :  { %3192 = vmatprep.subr.bf16.mxu1 %v3859_v0  ;;  %3208 = vmatprep.subr.bf16.mxu0 %v3859_v0  ;;  %v395_v23 = vpop.permute.xlu0 %394  ;;  %v446_v25 = vpop.permute.xlu1 %445 }
  0xcd   :  { %v397_v24 = vsel %vm396_vm5, %v393_v22, %v395_v23 }
  0xcf   :  { %3193 = vmatpush3.bf16.msra.mxu1 %v3989_v7  ;;  %3209 = vmatpush3.bf16.msra.mxu0 %v3989_v7 }
  0xd0   :  { %3194 = vmatprep.subr.bf16.mxu1 %v3859_v0  ;;  %3210 = vmatprep.subr.bf16.mxu0 %v3859_v0  ;;  %v500_v26 = vpop.permute.xlu1 %499  ;;  %v498_v27 = vpop.permute.xlu0 %497 }
  0xd1   :  { %v502_v28 = vsel %vm501_vm6, %v498_v27, %v500_v26 }
  0xd3   :  { %3195 = vmatpush3.bf16.msra.mxu1 %v4001_v9  ;;  %3211 = vmatpush3.bf16.msra.mxu0 %v4001_v9 }
  0xd4   :  { %3196 = vmatprep.subr.bf16.mxu1 %v3859_v0  ;;  %3212 = vmatprep.subr.bf16.mxu0 %v3859_v0  ;;  %v551_v29 = vpop.permute.xlu0 %550  ;;  %v605_v30 = vpop.permute.xlu1 %604 }
  0xd7   :  { %3197 = vmatpush3.bf16.msra.mxu1 %v4009_v10  ;;  %3213 = vmatpush3.bf16.msra.mxu0 %v4009_v10 }
  0xd8   :  { %3198 = vmatprep.subr.bf16.mxu1 %v3859_v0  ;;  %3214 = vmatprep.subr.bf16.mxu0 %v3859_v0  ;;  %v607_v31 = vpop.permute.xlu0 %606  ;;  %v658_v33 = vpop.permute.xlu1 %657 }
  0xd9   :  { %v609_v32 = vsel %vm608_vm7, %v605_v30, %v607_v31 }
  0xdb   :  { %3199 = vmatpush3.bf16.msra.mxu1 %v4021_v12  ;;  %3215 = vmatpush3.bf16.msra.mxu0 %v4021_v12 }
  0xdc   :  { %3220 = vmatprep.subr.bf16.mxu1 %v3859_v0  ;;  %3236 = vmatprep.subr.bf16.mxu0 %v3859_v0  ;;  %v660_v34 = vpop.permute.xlu0 %659  ;;  %v714_v35 = vpop.permute.xlu1 %713 }
  0xdd   :  { %v662_v37 = vsel %vm661_vm8, %v658_v33, %v660_v34 }
  0xde   :  { %3201 = vmatmul.mubr.msk.bf16.vlgmr.msra.gmra.mxu1 %vm177_vm2, %v339_v21  ;;  %3217 = vmatmul.mubr.msk.bf16.vlgmr.msra.gmra.mxu0 %vm177_vm2, %v397_v24 }
  0xdf   :  { %3221 = vmatpush3.bf16.msra.mxu1 %v3971_v4  ;;  %3237 = vmatpush3.bf16.msra.mxu0 %v3971_v4 }
  0xe0   :  { %3222 = vmatprep.subr.bf16.mxu1 %v3859_v0  ;;  %3238 = vmatprep.subr.bf16.mxu0 %v3859_v0  ;;  %v716_v36 = vpop.permute.xlu0 %715  ;;  %v767_v44 = vpop.permute.xlu1 %766 }
  0xe1   :  { %3232 = vmatprep.mubr.msk.bf16.mxu1 %vm3860_vm0, %v3859_v0  ;;  %3248 = vmatprep.mubr.msk.bf16.mxu0 %vm3860_vm0, %v3859_v0  ;;  %v718_v38 = vsel %vm717_vm9, %v714_v35, %v716_v36 }
  0xe3   :  { %3223 = vmatpush3.bf16.msra.mxu1 %v3977_v5  ;;  %3239 = vmatpush3.bf16.msra.mxu0 %v3977_v5 }
  0xe4   :  { %3224 = vmatprep.subr.bf16.mxu1 %v3859_v0  ;;  %3240 = vmatprep.subr.bf16.mxu0 %v3859_v0  ;;  %v769_v48 = vpop.permute.xlu0 %768  ;;  %v820_v51 = vpop.permute.xlu1 %819 }
  0xe5   :  { %v771_v52 = vsel %vm770_vm10, %v767_v44, %v769_v48 }
  0xe7   :  { %3225 = vmatpush3.bf16.msra.mxu1 %v3989_v7  ;;  %3241 = vmatpush3.bf16.msra.mxu0 %v3989_v7 }
  0xe8   :  { %3226 = vmatprep.subr.bf16.mxu1 %v3859_v0  ;;  %3242 = vmatprep.subr.bf16.mxu0 %v3859_v0  ;;  %v876_v2 = vpop.permute.xlu1 %875 }
  0xeb   :  { %3227 = vmatpush3.bf16.msra.mxu1 %v4001_v9  ;;  %3243 = vmatpush3.bf16.msra.mxu0 %v4001_v9 }
  0xec   :  { %3228 = vmatprep.subr.bf16.mxu1 %v3859_v0  ;;  %3244 = vmatprep.subr.bf16.mxu0 %v3859_v0 }
  0xef   :  { %3229 = vmatpush3.bf16.msra.mxu1 %v4009_v10  ;;  %3245 = vmatpush3.bf16.msra.mxu0 %v4009_v10 }
  0xf0   :  { %3230 = vmatprep.subr.bf16.mxu1 %v3859_v0  ;;  %3246 = vmatprep.subr.bf16.mxu0 %v3859_v0 }
  0xf3   :  { %3231 = vmatpush3.bf16.msra.mxu1 %v4021_v12  ;;  %3247 = vmatpush3.bf16.msra.mxu0 %v4021_v12 }
  0xf4   :  { %3252 = vmatprep.subr.bf16.mxu1 %v3859_v0  ;;  %3268 = vmatprep.subr.bf16.mxu0 %v3859_v0 }
  0xf6   :  { %3233 = vmatmul.mubr.msk.bf16.vlgmr.msra.gmra.mxu1 %vm177_vm2, %v446_v25  ;;  %3249 = vmatmul.mubr.msk.bf16.vlgmr.msra.gmra.mxu0 %vm177_vm2, %v502_v28 }
  0xf7   :  { %3253 = vmatpush3.bf16.msra.mxu1 %v3971_v4  ;;  %3269 = vmatpush3.bf16.msra.mxu0 %v3971_v4 }
  0xf8   :  { %3254 = vmatprep.subr.bf16.mxu1 %v3859_v0  ;;  %3270 = vmatprep.subr.bf16.mxu0 %v3859_v0 }
  0xf9   :  { %3264 = vmatprep.mubr.msk.bf16.mxu1 %vm3860_vm0, %v3859_v0  ;;  %3280 = vmatprep.mubr.msk.bf16.mxu0 %vm3860_vm0, %v3859_v0 }
  0xfb   :  { %3255 = vmatpush3.bf16.msra.mxu1 %v3977_v5  ;;  %3271 = vmatpush3.bf16.msra.mxu0 %v3977_v5 }
  0xfc   :  { %3256 = vmatprep.subr.bf16.mxu1 %v3859_v0  ;;  %3272 = vmatprep.subr.bf16.mxu0 %v3859_v0 }
  0xff   :  { %3257 = vmatpush3.bf16.msra.mxu1 %v3989_v7  ;;  %3273 = vmatpush3.bf16.msra.mxu0 %v3989_v7 }
 0x100   :  { %3258 = vmatprep.subr.bf16.mxu1 %v3859_v0  ;;  %3274 = vmatprep.subr.bf16.mxu0 %v3859_v0 }
 0x103   :  { %3259 = vmatpush3.bf16.msra.mxu1 %v4001_v9  ;;  %3275 = vmatpush3.bf16.msra.mxu0 %v4001_v9 }
 0x104   :  { %3260 = vmatprep.subr.bf16.mxu1 %v3859_v0  ;;  %3276 = vmatprep.subr.bf16.mxu0 %v3859_v0 }
 0x107   :  { %3261 = vmatpush3.bf16.msra.mxu1 %v4009_v10  ;;  %3277 = vmatpush3.bf16.msra.mxu0 %v4009_v10 }
 0x108   :  { %3262 = vmatprep.subr.bf16.mxu1 %v3859_v0  ;;  %3278 = vmatprep.subr.bf16.mxu0 %v3859_v0 }
 0x10b   :  { %3263 = vmatpush3.bf16.msra.mxu1 %v4021_v12  ;;  %3279 = vmatpush3.bf16.msra.mxu0 %v4021_v12 }
 0x10c   :  { %3300 = vmatprep.subr.bf16.mxu0 %v3859_v0  ;;  %3284 = vmatprep.subr.bf16.mxu1 %v3859_v0 }
 0x10e   :  { %3265 = vmatmul.mubr.msk.bf16.vlgmr.msra.gmra.mxu1 %vm177_vm2, %v551_v29  ;;  %3281 = vmatmul.mubr.msk.bf16.vlgmr.msra.gmra.mxu0 %vm177_vm2, %v609_v32 }
 0x10f   :  { %3301 = vmatpush3.bf16.msra.mxu0 %v3971_v4  ;;  %3285 = vmatpush3.bf16.msra.mxu1 %v3971_v4 }
 0x110   :  { %3302 = vmatprep.subr.bf16.mxu0 %v3859_v0  ;;  %3286 = vmatprep.subr.bf16.mxu1 %v3859_v0 }
 0x111   :  { %3312 = vmatprep.mubr.msk.bf16.mxu0 %vm3860_vm0, %v3859_v0  ;;  %3296 = vmatprep.mubr.msk.bf16.mxu1 %vm3860_vm0, %v3859_v0 }
 0x113   :  { %3303 = vmatpush3.bf16.msra.mxu0 %v3977_v5  ;;  %3287 = vmatpush3.bf16.msra.mxu1 %v3977_v5 }
 0x114   :  { %3304 = vmatprep.subr.bf16.mxu0 %v3859_v0  ;;  %3288 = vmatprep.subr.bf16.mxu1 %v3859_v0 }
 0x117   :  { %3305 = vmatpush3.bf16.msra.mxu0 %v3989_v7  ;;  %3289 = vmatpush3.bf16.msra.mxu1 %v3989_v7 }
 0x118   :  { %3306 = vmatprep.subr.bf16.mxu0 %v3859_v0  ;;  %3290 = vmatprep.subr.bf16.mxu1 %v3859_v0 }
 0x11b   :  { %3307 = vmatpush3.bf16.msra.mxu0 %v4001_v9  ;;  %3291 = vmatpush3.bf16.msra.mxu1 %v4001_v9 }
 0x11c   :  { %3308 = vmatprep.subr.bf16.mxu0 %v3859_v0  ;;  %3292 = vmatprep.subr.bf16.mxu1 %v3859_v0 }
 0x11f   :  { %3309 = vmatpush3.bf16.msra.mxu0 %v4009_v10  ;;  %3293 = vmatpush3.bf16.msra.mxu1 %v4009_v10 }
 0x120   :  { %3310 = vmatprep.subr.bf16.mxu0 %v3859_v0  ;;  %3294 = vmatprep.subr.bf16.mxu1 %v3859_v0 }
 0x123   :  { %3311 = vmatpush3.bf16.msra.mxu0 %v4021_v12  ;;  %3295 = vmatpush3.bf16.msra.mxu1 %v4021_v12 }
 0x124   :  { %3332 = vmatprep.subr.bf16.mxu0 %v3859_v0  ;;  %3316 = vmatprep.subr.bf16.mxu1 %v3859_v0 }
 0x126   :  { %3313 = vmatmul.mubr.msk.bf16.vlgmr.msra.gmra.mxu0 %vm177_vm2, %v718_v38  ;;  %3297 = vmatmul.mubr.msk.bf16.vlgmr.msra.gmra.mxu1 %vm177_vm2, %v662_v37 }
 0x127   :  { %3333 = vmatpush3.bf16.msra.mxu0 %v3971_v4  ;;  %3317 = vmatpush3.bf16.msra.mxu1 %v3971_v4  ;;  %v219_v39 = vpop.f32.mrf.mxu1 }
 0x128   :  { %3334 = vmatprep.subr.bf16.mxu0 %v3859_v0  ;;  %3318 = vmatprep.subr.bf16.mxu1 %v3859_v0  ;;  %v220_v45 = vadd.f32 %v4195_v43, %v219_v39 }
 0x129   :  { %3344 = vmatprep.mubr.msk.bf16.mxu0 %vm3860_vm0, %v3859_v0  ;;  %3328 = vmatprep.mubr.msk.bf16.mxu1 %vm3860_vm0, %v3859_v0  ;;  %v3154_v40 = vpop.f32.mrf.mxu1 }
 0x12a   :  { %v226_v49 = vmax.f32 %v220_v45, 0.0 }
 0x12b   :  { %3335 = vmatpush3.bf16.msra.mxu0 %v3977_v5  ;;  %3319 = vmatpush3.bf16.msra.mxu1 %v3977_v5  ;;  %v222_v41 = vpop.f32.mrf.mxu1 }
 0x12c   :  { %3336 = vmatprep.subr.bf16.mxu0 %v3859_v0  ;;  %3320 = vmatprep.subr.bf16.mxu1 %v3859_v0  ;;  %v223_v46 = vadd.f32 %v4195_v43, %v222_v41 }
 0x12d   :  { %v3155_v42 = vpop.f32.mrf.mxu1 }
 0x12e   :  { %v227_v50 = vmax.f32 %v223_v46, 0.0 }
 0x12f   :  { %3337 = vmatpush3.bf16.msra.mxu0 %v3989_v7  ;;  %3321 = vmatpush3.bf16.msra.mxu1 %v3989_v7 }
 0x130   :  { %3338 = vmatprep.subr.bf16.mxu0 %v3859_v0  ;;  %3322 = vmatprep.subr.bf16.mxu1 %v3859_v0  ;;  %v228_v55 = vpack.c.bf16 %v227_v50, %v226_v49 }
 0x133   :  { %3339 = vmatpush3.bf16.msra.mxu0 %v4001_v9  ;;  %3323 = vmatpush3.bf16.msra.mxu1 %v4001_v9 }
 0x134   :  { %3340 = vmatprep.subr.bf16.mxu0 %v3859_v0  ;;  %3324 = vmatprep.subr.bf16.mxu1 %v3859_v0 }
 0x137   :  { %3341 = vmatpush3.bf16.msra.mxu0 %v4009_v10  ;;  %3325 = vmatpush3.bf16.msra.mxu1 %v4009_v10 }
 0x138   :  { %3342 = vmatprep.subr.bf16.mxu0 %v3859_v0  ;;  %3326 = vmatprep.subr.bf16.mxu1 %v3859_v0 }
 0x13b   :  { %3343 = vmatpush3.bf16.msra.mxu0 %v4021_v12  ;;  %3327 = vmatpush3.bf16.msra.mxu1 %v4021_v12 }
 0x13c   :  { %2790 = vmatprep.subr.bf16.mxu0 %v4210_v47  ;;  %3348 = vmatprep.subr.bf16.mxu1 %v3859_v0 }
 0x13e   :  { %3345 = vmatmul.mubr.msk.bf16.vlgmr.msra.gmra.mxu0 %vm177_vm2, %v820_v51  ;;  %3329 = vmatmul.mubr.msk.bf16.vlgmr.msra.gmra.mxu1 %vm177_vm2, %v771_v52 }
 0x13f   :  { %2791 = vmatpush3.bf16.msra.mxu0 %v4217_v53  ;;  %3349 = vmatpush3.bf16.msra.mxu1 %v3971_v4  ;;  %v874_v4 = vpop.permute.xlu0 %873 }
 0x140   :  { %2792 = vmatprep.subr.bf16.mxu0 %v4224_v54  ;;  %3350 = vmatprep.subr.bf16.mxu1 %v3859_v0 }
 0x141   :  { %3360 = vmatprep.mubr.msk.bf16.mxu1 %vm3860_vm0, %v3859_v0  ;;  %1157 = vmatprep.mubr.bf16.mxu0 %v228_v55 }
 0x143   :  { %2793 = vmatpush3.bf16.msra.mxu0 %v4233_v56  ;;  %3351 = vmatpush3.bf16.msra.mxu1 %v3977_v5  ;;  %v878_v5 = vsel %vm877_vm11, %v874_v4, %v876_v2 }
 0x144   :  { %2794 = vmatprep.subr.bf16.mxu0 %v4240_v57  ;;  %3352 = vmatprep.subr.bf16.mxu1 %v3859_v0 }
 0x147   :  { %2795 = vmatpush3.bf16.msra.mxu0 %v4249_v58  ;;  %3353 = vmatpush3.bf16.msra.mxu1 %v3989_v7  ;;  %v4310_v7 = vld [vmem:[%s4886_s3 + $0xb8] sm:$0xff]  }
 0x148   :  { %2796 = vmatprep.subr.bf16.mxu0 %v4256_v59  ;;  %3354 = vmatprep.subr.bf16.mxu1 %v3859_v0 }
 0x14b   :  { %2797 = vmatpush3.bf16.msra.mxu0 %v4263_v60  ;;  %3355 = vmatpush3.bf16.msra.mxu1 %v4001_v9  ;;  %v4324_v9 = vld [vmem:[%s4886_s3] sm:$0xff]  }
 0x14c   :  { %2798 = vmatprep.subr.bf16.mxu0 %v4270_v61  ;;  %3356 = vmatprep.subr.bf16.mxu1 %v3859_v0 }
 0x14f   :  { %2799 = vmatpush3.bf16.msra.mxu0 %v4277_v62  ;;  %3357 = vmatpush3.bf16.msra.mxu1 %v4009_v10  ;;  %v4330_v10 = vld [vmem:[%s4886_s3 + $0xb0] sm:$0xff]  }
 0x150   :  { %2800 = vmatprep.subr.bf16.mxu0 %v4284_v63  ;;  %3358 = vmatprep.subr.bf16.mxu1 %v3859_v0 }
 0x153   :  { %2801 = vmatpush3.bf16.msra.mxu0 %v4291_v1  ;;  %3359 = vmatpush3.bf16.msra.mxu1 %v4021_v12  ;;  %v3873_v12 = vmov 0  }
 0x154   :  { %2802 = vmatprep.subr.bf16.mxu0 %v4298_v3  ;;  %3364 = vmatprep.subr.bf16.mxu1 %v3859_v0 }
 0x156   :  { %3361 = vmatmul.mubr.msk.bf16.vlgmr.msra.gmra.mxu1 %vm177_vm2, %v878_v5 }
 0x157   :  { %2803 = vmatpush3.bf16.msra.mxu0 %v4305_v6  ;;  %3365 = vmatpush3.bf16.msra.mxu1 %v4310_v7 }
 0x158   :  { %2804 = vmatprep.subr.bf16.mxu0 %v4316_v8  ;;  %3366 = vmatprep.subr.bf16.mxu1 %v3859_v0 }
 0x159   :  { %3380 = vmatprep.mubr.msk.bf16.mxu1 %vm3860_vm0, %v3859_v0 }
 0x15b   :  { %2805 = vmatpush3.bf16.msra.mxu0 %v4324_v9  ;;  %3367 = vmatpush3.bf16.msra.mxu1 %v4330_v10 }
 0x15c   :  { %2821 = vmatprep.subr.bf16.mxu0 %v4210_v47  ;;  %3368 = vmatprep.subr.bf16.mxu1 %v3859_v0 }
 0x15e   :  { %1158 = vmatmul.mubr.bf16.vlgmr.msra.gmra.mxu0 %v3873_v12 }
 0x15f   :  { %2822 = vmatpush3.bf16.msra.mxu0 %v4217_v53  ;;  %3369 = vmatpush3.bf16.msra.mxu1 %v4341_v11 }
 0x160   :  { %2823 = vmatprep.subr.bf16.mxu0 %v4224_v54  ;;  %3370 = vmatprep.subr.bf16.mxu1 %v3859_v0 }
 0x163   :  { %2824 = vmatpush3.bf16.msra.mxu0 %v4233_v56  ;;  %3371 = vmatpush3.bf16.msra.mxu1 %v4350_v13 }
 0x164   :  { %2825 = vmatprep.subr.bf16.mxu0 %v4240_v57  ;;  %3372 = vmatprep.subr.bf16.mxu1 %v3859_v0 }
 0x167   :  { %2826 = vmatpush3.bf16.msra.mxu0 %v4249_v58  ;;  %3373 = vmatpush3.bf16.msra.mxu1 %v4359_v14 }
 0x168   :  { %2827 = vmatprep.subr.bf16.mxu0 %v4256_v59  ;;  %3374 = vmatprep.subr.bf16.mxu1 %v3859_v0 }
 0x16b   :  { %2828 = vmatpush3.bf16.msra.mxu0 %v4263_v60  ;;  %3375 = vmatpush3.bf16.msra.mxu1 %v4368_v15 }
 0x16c   :  { %2829 = vmatprep.subr.bf16.mxu0 %v4270_v61  ;;  %3376 = vmatprep.subr.bf16.mxu1 %v3859_v0 }
 0x16f   :  { %2830 = vmatpush3.bf16.msra.mxu0 %v4277_v62  ;;  %3377 = vmatpush3.bf16.msra.mxu1 %v4377_v16 }
 0x170   :  { %2831 = vmatprep.subr.bf16.mxu0 %v4284_v63  ;;  %3378 = vmatprep.subr.bf16.mxu1 %v3859_v0 }
 0x173   :  { %2832 = vmatpush3.bf16.msra.mxu0 %v4291_v1  ;;  %3379 = vmatpush3.bf16.msra.mxu1 %v4386_v17 }
 0x174   :  { %2833 = vmatprep.subr.bf16.mxu0 %v4298_v3  ;;  %3384 = vmatprep.subr.bf16.mxu1 %v3859_v0 }
 0x177   :  { %2834 = vmatpush3.bf16.msra.mxu0 %v4305_v6 }
 0x178   :  { %2835 = vmatprep.subr.bf16.mxu0 %v4316_v8 }
 0x17b   :  { %2836 = vmatpush3.bf16.msra.mxu0 %v4324_v9 }
 0x17c   :  { %2852 = vmatprep.subr.bf16.mxu0 %v4210_v47 }
 0x186   :  { %v275_v18 = vpop.f32.mrf.mxu1  ;;  %v328_v19 = vpop.f32.mrf.mxu0 }
 0x187   :  { %v329_v20 = vadd.f32 %v4195_v43, %v328_v19  ;;  %v276_v23 = vadd.f32 %v4195_v43, %v275_v18 }
 0x188   :  { %v3170_v21 = vpop.f32.mrf.mxu1  ;;  %v3186_v22 = vpop.f32.mrf.mxu0 }
 0x189   :  { %v335_v26 = vmax.f32 %v329_v20, 0.0  ;;  %v282_v31 = vmax.f32 %v276_v23, 0.0 }
 0x18a   :  { %v278_v24 = vpop.f32.mrf.mxu1  ;;  %v331_v25 = vpop.f32.mrf.mxu0 }
 0x18b   :  { %v279_v27 = vadd.f32 %v4195_v43, %v278_v24  ;;  %v332_v28 = vadd.f32 %v4195_v43, %v331_v25 }
 0x18c   :  { %v3171_v29 = vpop.f32.mrf.mxu1  ;;  %v3187_v30 = vpop.f32.mrf.mxu0 }
 0x18d   :  { %v283_v32 = vmax.f32 %v279_v27, 0.0  ;;  %v336_v33 = vmax.f32 %v332_v28, 0.0 }
 0x18f   :  { %v284_v34 = vpack.c.bf16 %v283_v32, %v282_v31  ;;  %v337_v35 = vpack.c.bf16 %v336_v33, %v335_v26 }
 0x191   :  { %3381 = vmatmul.mubr.bf16.vlgmr.msra.gmra.mxu1 %v284_v34  ;;  %1242 = vmatprep.mubr.bf16.mxu0 %v337_v35 }
 0x192   :  { %3385 = vmatpush3.bf16.msra.mxu1 %v4310_v7  ;;  %1243 = vmatmul.mubr.bf16.vlgmr.msra.gmra.mxu0 %v284_v34 }
 0x193   :  { %2853 = vmatpush3.bf16.msra.mxu0 %v4217_v53  ;;  %3386 = vmatprep.subr.bf16.mxu1 %v3859_v0 }
 0x194   :  { %2854 = vmatprep.subr.bf16.mxu0 %v4224_v54  ;;  %3400 = vmatprep.mubr.msk.bf16.mxu1 %vm3860_vm0, %v3859_v0 }
 0x196   :  { %3387 = vmatpush3.bf16.msra.mxu1 %v4330_v10 }
 0x197   :  { %2855 = vmatpush3.bf16.msra.mxu0 %v4233_v56  ;;  %3388 = vmatprep.subr.bf16.mxu1 %v3859_v0 }
 0x198   :  { %2856 = vmatprep.subr.bf16.mxu0 %v4240_v57 }
 0x19a   :  { %3389 = vmatpush3.bf16.msra.mxu1 %v4341_v11 }
 0x19b   :  { %2857 = vmatpush3.bf16.msra.mxu0 %v4249_v58  ;;  %3390 = vmatprep.subr.bf16.mxu1 %v3859_v0 }
 0x19c   :  { %2858 = vmatprep.subr.bf16.mxu0 %v4256_v59 }
 0x19e   :  { %3391 = vmatpush3.bf16.msra.mxu1 %v4350_v13  ;;  %v377_v36 = vpop.f32.mrf.mxu1  ;;  %v435_v37 = vpop.f32.mrf.mxu0 }
 0x19f   :  { %2859 = vmatpush3.bf16.msra.mxu0 %v4263_v60  ;;  %3392 = vmatprep.subr.bf16.mxu1 %v3859_v0  ;;  %v436_v38 = vadd.f32 %v4195_v43, %v435_v37  ;;  %v378_v50 = vadd.f32 %v4195_v43, %v377_v36 }
 0x1a0   :  { %2860 = vmatprep.subr.bf16.mxu0 %v4270_v61  ;;  %v3202_v39 = vpop.f32.mrf.mxu1  ;;  %v3218_v40 = vpop.f32.mrf.mxu0 }
 0x1a1   :  { %v442_v44 = vmax.f32 %v436_v38, 0.0  ;;  %v384_v55 = vmax.f32 %v378_v50, 0.0 }
 0x1a2   :  { %3393 = vmatpush3.bf16.msra.mxu1 %v4359_v14  ;;  %v380_v41 = vpop.f32.mrf.mxu1  ;;  %v438_v42 = vpop.f32.mrf.mxu0 }
 0x1a3   :  { %2861 = vmatpush3.bf16.msra.mxu0 %v4277_v62  ;;  %3394 = vmatprep.subr.bf16.mxu1 %v3859_v0  ;;  %v439_v45 = vadd.f32 %v4195_v43, %v438_v42  ;;  %v381_v51 = vadd.f32 %v4195_v43, %v380_v41 }
 0x1a4   :  { %2862 = vmatprep.subr.bf16.mxu0 %v4284_v63  ;;  %v3203_v46 = vpop.f32.mrf.mxu1  ;;  %v3219_v48 = vpop.f32.mrf.mxu0 }
 0x1a5   :  { %v443_v49 = vmax.f32 %v439_v45, 0.0  ;;  %v385_v2 = vmax.f32 %v381_v51, 0.0 }
 0x1a6   :  { %3395 = vmatpush3.bf16.msra.mxu1 %v4368_v15 }
 0x1a7   :  { %2863 = vmatpush3.bf16.msra.mxu0 %v4291_v1  ;;  %3396 = vmatprep.subr.bf16.mxu1 %v3859_v0  ;;  %v444_v52 = vpack.c.bf16 %v443_v49, %v442_v44  ;;  %v386_v4 = vpack.c.bf16 %v385_v2, %v384_v55 }
 0x1a8   :  { %2864 = vmatprep.subr.bf16.mxu0 %v4298_v3 }
 0x1a9   :  { %1327 = vmatprep.mubr.bf16.mxu0 %v444_v52 }
 0x1aa   :  { %3397 = vmatpush3.bf16.msra.mxu1 %v4377_v16 }
 0x1ab   :  { %2865 = vmatpush3.bf16.msra.mxu0 %v4305_v6  ;;  %3398 = vmatprep.subr.bf16.mxu1 %v3859_v0 }
 0x1ac   :  { %2866 = vmatprep.subr.bf16.mxu0 %v4316_v8 }
 0x1ae   :  { %3399 = vmatpush3.bf16.msra.mxu1 %v4386_v17 }
 0x1af   :  { %2867 = vmatpush3.bf16.msra.mxu0 %v4324_v9  ;;  %3404 = vmatprep.subr.bf16.mxu1 %v3859_v0 }
 0x1b0   :  { %2883 = vmatprep.subr.bf16.mxu0 %v4210_v47 }
 0x1b1   :  { %3401 = vmatmul.mubr.bf16.vlgmr.msra.gmra.mxu1 %v386_v4 }
 0x1b2   :  { %1328 = vmatmul.mubr.bf16.vlgmr.msra.gmra.mxu0 %v386_v4  ;;  %3405 = vmatpush3.bf16.msra.mxu1 %v4310_v7 }
 0x1b3   :  { %2884 = vmatpush3.bf16.msra.mxu0 %v4217_v53  ;;  %3406 = vmatprep.subr.bf16.mxu1 %v3859_v0 }
 0x1b4   :  { %2885 = vmatprep.subr.bf16.mxu0 %v4224_v54  ;;  %3420 = vmatprep.mubr.msk.bf16.mxu1 %vm3860_vm0, %v3859_v0 }
 0x1b6   :  { %3407 = vmatpush3.bf16.msra.mxu1 %v4330_v10  ;;  %v484_v5 = vpop.f32.mrf.mxu1  ;;  %v540_v12 = vpop.f32.mrf.mxu0 }
 0x1b7   :  { %2886 = vmatpush3.bf16.msra.mxu0 %v4233_v56  ;;  %3408 = vmatprep.subr.bf16.mxu1 %v3859_v0  ;;  %v541_v18 = vadd.f32 %v4195_v43, %v540_v12  ;;  %v485_v29 = vadd.f32 %v4195_v43, %v484_v5 }
 0x1b8   :  { %2887 = vmatprep.subr.bf16.mxu0 %v4240_v57  ;;  %v3234_v19 = vpop.f32.mrf.mxu1  ;;  %v3250_v20 = vpop.f32.mrf.mxu0 }
 0x1b9   :  { %v547_v23 = vmax.f32 %v541_v18, 0.0  ;;  %v491_v31 = vmax.f32 %v485_v29, 0.0 }
 0x1ba   :  { %3409 = vmatpush3.bf16.msra.mxu1 %v4341_v11  ;;  %v487_v21 = vpop.f32.mrf.mxu1  ;;  %v543_v22 = vpop.f32.mrf.mxu0 }
 0x1bb   :  { %2888 = vmatpush3.bf16.msra.mxu0 %v4249_v58  ;;  %3410 = vmatprep.subr.bf16.mxu1 %v3859_v0  ;;  %v544_v24 = vadd.f32 %v4195_v43, %v543_v22  ;;  %v488_v30 = vadd.f32 %v4195_v43, %v487_v21 }
 0x1bc   :  { %2889 = vmatprep.subr.bf16.mxu0 %v4256_v59  ;;  %v3235_v25 = vpop.f32.mrf.mxu1  ;;  %v3251_v26 = vpop.f32.mrf.mxu0 }
 0x1bd   :  { %v548_v27 = vmax.f32 %v544_v24, 0.0  ;;  %v492_v32 = vmax.f32 %v488_v30, 0.0 }
 0x1be   :  { %3411 = vmatpush3.bf16.msra.mxu1 %v4350_v13 }
 0x1bf   :  { %2890 = vmatpush3.bf16.msra.mxu0 %v4263_v60  ;;  %3412 = vmatprep.subr.bf16.mxu1 %v3859_v0  ;;  %v549_v28 = vpack.c.bf16 %v548_v27, %v547_v23  ;;  %v493_v35 = vpack.c.bf16 %v492_v32, %v491_v31 }
 0x1c0   :  { %2891 = vmatprep.subr.bf16.mxu0 %v4270_v61 }
 0x1c1   :  { %1412 = vmatprep.mubr.bf16.mxu0 %v549_v28 }
 0x1c2   :  { %3413 = vmatpush3.bf16.msra.mxu1 %v4359_v14 }
 0x1c3   :  { %2892 = vmatpush3.bf16.msra.mxu0 %v4277_v62  ;;  %3414 = vmatprep.subr.bf16.mxu1 %v3859_v0 }
 0x1c4   :  { %2893 = vmatprep.subr.bf16.mxu0 %v4284_v63 }
 0x1c6   :  { %3415 = vmatpush3.bf16.msra.mxu1 %v4368_v15 }
 0x1c7   :  { %2894 = vmatpush3.bf16.msra.mxu0 %v4291_v1  ;;  %3416 = vmatprep.subr.bf16.mxu1 %v3859_v0 }
 0x1c8   :  { %2895 = vmatprep.subr.bf16.mxu0 %v4298_v3 }
 0x1ca   :  { %3417 = vmatpush3.bf16.msra.mxu1 %v4377_v16 }
 0x1cb   :  { %2896 = vmatpush3.bf16.msra.mxu0 %v4305_v6  ;;  %3418 = vmatprep.subr.bf16.mxu1 %v3859_v0 }
 0x1cc   :  { %2897 = vmatprep.subr.bf16.mxu0 %v4316_v8 }
 0x1ce   :  { %3419 = vmatpush3.bf16.msra.mxu1 %v4386_v17  ;;  %v589_v33 = vpop.f32.mrf.mxu1  ;;  %v647_v34 = vpop.f32.mrf.mxu0 }
 0x1cf   :  { %2898 = vmatpush3.bf16.msra.mxu0 %v4324_v9  ;;  %3424 = vmatprep.subr.bf16.mxu1 %v3859_v0  ;;  %v648_v36 = vadd.f32 %v4195_v43, %v647_v34  ;;  %v590_v51 = vadd.f32 %v4195_v43, %v589_v33 }
 0x1d0   :  { %2914 = vmatprep.subr.bf16.mxu0 %v4210_v47  ;;  %v3266_v37 = vpop.f32.mrf.mxu1  ;;  %v3282_v38 = vpop.f32.mrf.mxu0 }
 0x1d1   :  { %3421 = vmatmul.mubr.bf16.vlgmr.msra.gmra.mxu1 %v493_v35  ;;  %v654_v41 = vmax.f32 %v648_v36, 0.0  ;;  %v596_v18 = vmax.f32 %v590_v51, 0.0 }
 0x1d2   :  { %1413 = vmatmul.mubr.bf16.vlgmr.msra.gmra.mxu0 %v493_v35  ;;  %3425 = vmatpush3.bf16.msra.mxu1 %v4310_v7  ;;  %v592_v39 = vpop.f32.mrf.mxu1  ;;  %v650_v40 = vpop.f32.mrf.mxu0 }
 0x1d3   :  { %2915 = vmatpush3.bf16.msra.mxu0 %v4217_v53  ;;  %3426 = vmatprep.subr.bf16.mxu1 %v3859_v0  ;;  %v651_v42 = vadd.f32 %v4195_v43, %v650_v40  ;;  %v593_v52 = vadd.f32 %v4195_v43, %v592_v39 }
 0x1d4   :  { %2916 = vmatprep.subr.bf16.mxu0 %v4224_v54  ;;  %v3267_v44 = vpop.f32.mrf.mxu1  ;;  %3440 = vmatprep.mubr.msk.bf16.mxu1 %vm3860_vm0, %v3859_v0  ;;  %v3283_v45 = vpop.f32.mrf.mxu0 }
 0x1d5   :  { %v655_v46 = vmax.f32 %v651_v42, 0.0  ;;  %v597_v19 = vmax.f32 %v593_v52, 0.0  ;;  %v4710_v52 = vld [vmem:[%s4888_s5] sm:$0xff]  }
 0x1d6   :  { %3427 = vmatpush3.bf16.msra.mxu1 %v4330_v10 }
 0x1d7   :  { %2917 = vmatpush3.bf16.msra.mxu0 %v4233_v56  ;;  %3428 = vmatprep.subr.bf16.mxu1 %v3859_v0  ;;  %v656_v48 = vpack.c.bf16 %v655_v46, %v654_v41  ;;  %v598_v25 = vpack.c.bf16 %v597_v19, %v596_v18  ;;  %v4735_v18 = vld [vmem:[%s4888_s5 + $0xa8] sm:$0xff]  }
 0x1d8   :  { %2918 = vmatprep.subr.bf16.mxu0 %v4240_v57 }
 0x1d9   :  { %1497 = vmatprep.mubr.bf16.mxu0 %v656_v48  ;;  %v4684_v48 = vld [vmem:[%s4888_s5 + $0x48] sm:$0xff]  }
 0x1da   :  { %3429 = vmatpush3.bf16.msra.mxu1 %v4341_v11 }
 0x1db   :  { %2919 = vmatpush3.bf16.msra.mxu0 %v4249_v58  ;;  %3430 = vmatprep.subr.bf16.mxu1 %v3859_v0 }
 0x1dc   :  { %2920 = vmatprep.subr.bf16.mxu0 %v4256_v59 }
 0x1de   :  { %3431 = vmatpush3.bf16.msra.mxu1 %v4350_v13 }
 0x1df   :  { %2921 = vmatpush3.bf16.msra.mxu0 %v4263_v60  ;;  %3432 = vmatprep.subr.bf16.mxu1 %v3859_v0 }
 0x1e0   :  { %2922 = vmatprep.subr.bf16.mxu0 %v4270_v61 }
 0x1e2   :  { %3433 = vmatpush3.bf16.msra.mxu1 %v4359_v14 }
 0x1e3   :  { %2923 = vmatpush3.bf16.msra.mxu0 %v4277_v62  ;;  %3434 = vmatprep.subr.bf16.mxu1 %v3859_v0 }
 0x1e4   :  { %2924 = vmatprep.subr.bf16.mxu0 %v4284_v63 }
 0x1e6   :  { %3435 = vmatpush3.bf16.msra.mxu1 %v4368_v15  ;;  %v700_v49 = vpop.f32.mrf.mxu1  ;;  %v756_v50 = vpop.f32.mrf.mxu0 }
 0x1e7   :  { %2925 = vmatpush3.bf16.msra.mxu0 %v4291_v1  ;;  %3436 = vmatprep.subr.bf16.mxu1 %v3859_v0  ;;  %v757_v4 = vadd.f32 %v4195_v43, %v756_v50  ;;  %v701_v35 = vadd.f32 %v4195_v43, %v700_v49  ;;  %v4696_v50 = vld [vmem:[%s4888_s5 + $0x8] sm:$0xff]  }
 0x1e8   :  { %2926 = vmatprep.subr.bf16.mxu0 %v4298_v3  ;;  %v3298_v55 = vpop.f32.mrf.mxu1  ;;  %v3314_v2 = vpop.f32.mrf.mxu0 }
 0x1e9   :  { %v763_v23 = vmax.f32 %v757_v4, 0.0  ;;  %v707_v39 = vmax.f32 %v701_v35, 0.0  ;;  %v4717_v55 = vld [vmem:[%s4888_s5 + $0xb8] sm:$0xff]  }
 0x1ea   :  { %3437 = vmatpush3.bf16.msra.mxu1 %v4377_v16  ;;  %v703_v5 = vpop.f32.mrf.mxu1  ;;  %v759_v12 = vpop.f32.mrf.mxu0 }
 0x1eb   :  { %2927 = vmatpush3.bf16.msra.mxu0 %v4305_v6  ;;  %3438 = vmatprep.subr.bf16.mxu1 %v3859_v0  ;;  %v760_v20 = vadd.f32 %v4195_v43, %v759_v12  ;;  %v704_v36 = vadd.f32 %v4195_v43, %v703_v5 }
 0x1ec   :  { %2928 = vmatprep.subr.bf16.mxu0 %v4316_v8  ;;  %v3299_v21 = vpop.f32.mrf.mxu1  ;;  %v3315_v22 = vpop.f32.mrf.mxu0 }
 0x1ed   :  { %v764_v24 = vmax.f32 %v760_v20, 0.0  ;;  %v708_v40 = vmax.f32 %v704_v36, 0.0  ;;  %v4742_v21 = vld [vmem:[%s4888_s5 + $0xa0] sm:$0xff]  }
 0x1ee   :  { %3439 = vmatpush3.bf16.msra.mxu1 %v4386_v17 }
 0x1ef   :  { %2929 = vmatpush3.bf16.msra.mxu0 %v4324_v9  ;;  %3444 = vmatprep.subr.bf16.mxu1 %v3859_v0  ;;  %v765_v26 = vpack.c.bf16 %v764_v24, %v763_v23  ;;  %v709_v44 = vpack.c.bf16 %v708_v40, %v707_v39  ;;  %v4749_v23 = vld [vmem:[%s4888_s5 + $0x98] sm:$0xff]  }
 0x1f0   :  { %2945 = vmatprep.subr.bf16.mxu0 %v4210_v47 }
 0x1f1   :  { %3441 = vmatmul.mubr.bf16.vlgmr.msra.gmra.mxu1 %v598_v25 }
 0x1f2   :  { %1498 = vmatmul.mubr.bf16.vlgmr.msra.gmra.mxu0 %v598_v25  ;;  %3445 = vmatpush3.bf16.msra.mxu1 %v4310_v7 }
 0x1f3   :  { %2946 = vmatpush3.bf16.msra.mxu0 %v4217_v53  ;;  %3446 = vmatprep.subr.bf16.mxu1 %v3859_v0 }
 0x1f4   :  { %2947 = vmatprep.subr.bf16.mxu0 %v4224_v54  ;;  %3460 = vmatprep.mubr.msk.bf16.mxu1 %vm3860_vm0, %v3859_v0 }
 0x1f5   :  { %1582 = vmatprep.mubr.bf16.mxu0 %v765_v26  ;;  %v4756_v26 = vld [vmem:[%s4888_s5 + $0x90] sm:$0xff]  }
 0x1f6   :  { %3447 = vmatpush3.bf16.msra.mxu1 %v4330_v10 }
 0x1f7   :  { %2948 = vmatpush3.bf16.msra.mxu0 %v4233_v56  ;;  %3448 = vmatprep.subr.bf16.mxu1 %v3859_v0 }
 0x1f8   :  { %2949 = vmatprep.subr.bf16.mxu0 %v4240_v57 }
 0x1fa   :  { %3449 = vmatpush3.bf16.msra.mxu1 %v4341_v11 }
 0x1fb   :  { %2950 = vmatpush3.bf16.msra.mxu0 %v4249_v58  ;;  %3450 = vmatprep.subr.bf16.mxu1 %v3859_v0 }
 0x1fc   :  { %2951 = vmatprep.subr.bf16.mxu0 %v4256_v59 }
 0x1fe   :  { %3451 = vmatpush3.bf16.msra.mxu1 %v4350_v13  ;;  %v4533_v27 = vpop.f32.mrf.mxu1  ;;  %v858_v28 = vpop.f32.mrf.mxu0 }
 0x1ff   :  { %2952 = vmatpush3.bf16.msra.mxu0 %v4263_v60  ;;  %3452 = vmatprep.subr.bf16.mxu1 %v3859_v0  ;;  %v859_v37 = vadd.f32 %v4195_v43, %v858_v28  ;;  %v4763_v28 = vld [vmem:[%s4888_s5 + $0x88] sm:$0xff]  }
 0x200   :  { %2953 = vmatprep.subr.bf16.mxu0 %v4270_v61  ;;  %v3330_v29 = vpop.f32.mrf.mxu1  ;;  %v3346_v30 = vpop.f32.mrf.mxu0 }
 0x201   :  { %v865_v41 = vmax.f32 %v859_v37, 0.0  ;;  %v4770_v30 = vld [vmem:[%s4888_s5 + $0x80] sm:$0xff]  }
 0x202   :  { %3453 = vmatpush3.bf16.msra.mxu1 %v4359_v14  ;;  %v812_v31 = vpop.f32.mrf.mxu1  ;;  %v861_v32 = vpop.f32.mrf.mxu0 }
 0x203   :  { %2954 = vmatpush3.bf16.msra.mxu0 %v4277_v62  ;;  %3454 = vmatprep.subr.bf16.mxu1 %v3859_v0  ;;  %v862_v38 = vadd.f32 %v4195_v43, %v861_v32 }
 0x204   :  { %2955 = vmatprep.subr.bf16.mxu0 %v4284_v63  ;;  %v3331_v33 = vpop.f32.mrf.mxu1  ;;  %v3347_v34 = vpop.f32.mrf.mxu0 }
 0x205   :  { %v866_v42 = vmax.f32 %v862_v38, 0.0  ;;  %v4773_v33 = vld [vmem:[#allocation2] ss:$0 sm:$0xff] }
 0x206   :  { %3455 = vmatpush3.bf16.msra.mxu1 %v4368_v15 }
 0x207   :  { %2956 = vmatpush3.bf16.msra.mxu0 %v4291_v1  ;;  %3456 = vmatprep.subr.bf16.mxu1 %v3859_v0  ;;  %v867_v45 = vpack.c.bf16 %v866_v42, %v865_v41 }
 0x208   :  { %2957 = vmatprep.subr.bf16.mxu0 %v4298_v3 }
 0x20a   :  { %3457 = vmatpush3.bf16.msra.mxu1 %v4377_v16 }
 0x20b   :  { %2958 = vmatpush3.bf16.msra.mxu0 %v4305_v6  ;;  %3458 = vmatprep.subr.bf16.mxu1 %v3859_v0 }
 0x20c   :  { %2959 = vmatprep.subr.bf16.mxu0 %v4316_v8 }
 0x20e   :  { %3459 = vmatpush3.bf16.msra.mxu1 %v4386_v17 }
 0x20f   :  { %2960 = vmatpush3.bf16.msra.mxu0 %v4324_v9  ;;  %3464 = vmatprep.subr.bf16.mxu1 %v3859_v0 }
 0x210   :  { %2976 = vmatprep.subr.bf16.mxu0 %v4210_v47 }
 0x211   :  { %3461 = vmatmul.mubr.bf16.vlgmr.msra.gmra.mxu1 %v709_v44 }
 0x212   :  { %1583 = vmatmul.mubr.bf16.vlgmr.msra.gmra.mxu0 %v709_v44  ;;  %3465 = vmatpush3.bf16.msra.mxu1 %v4310_v7 }
 0x213   :  { %2977 = vmatpush3.bf16.msra.mxu0 %v4217_v53  ;;  %3466 = vmatprep.subr.bf16.mxu1 %v3859_v0 }
 0x214   :  { %2978 = vmatprep.subr.bf16.mxu0 %v4224_v54  ;;  %3480 = vmatprep.mubr.msk.bf16.mxu1 %vm3860_vm0, %v3859_v0 }
 0x215   :  { %1667 = vmatprep.mubr.bf16.mxu0 %v867_v45 }
 0x216   :  { %3467 = vmatpush3.bf16.msra.mxu1 %v4330_v10  ;;  %v4565_v46 = vpop.f32.mrf.mxu1 }
 0x217   :  { %2979 = vmatpush3.bf16.msra.mxu0 %v4233_v56  ;;  %3468 = vmatprep.subr.bf16.mxu1 %v3859_v0  ;;  %v810_v56 = vadd.f32 %v4195_v43, %v4533_v27 }
 0x218   :  { %2980 = vmatprep.subr.bf16.mxu0 %v4240_v57  ;;  %v3362_v47 = vpop.f32.mrf.mxu1  ;;  %v813_v57 = vadd.f32 %v4195_v43, %v812_v31 }
 0x21a   :  { %3469 = vmatpush3.bf16.msra.mxu1 %v4341_v11  ;;  %v4571_v53 = vpop.f32.mrf.mxu1 }
 0x21b   :  { %2981 = vmatpush3.bf16.msra.mxu0 %v4249_v58  ;;  %3470 = vmatprep.subr.bf16.mxu1 %v3859_v0  ;;  %v816_v58 = vmax.f32 %v810_v56, 0.0  ;;  %v920_v49 = vadd.f32 %v4195_v43, %v4571_v53 }
 0x21c   :  { %2982 = vmatprep.subr.bf16.mxu0 %v4256_v59  ;;  %v3363_v54 = vpop.f32.mrf.mxu1  ;;  %v817_v59 = vmax.f32 %v813_v57, 0.0 }
 0x21e   :  { %3471 = vmatpush3.bf16.msra.mxu1 %v4350_v13  ;;  %v2806_v4 = vpop.f32.mrf.mxu0 }
 0x21f   :  { %2983 = vmatpush3.bf16.msra.mxu0 %v4263_v60  ;;  %3472 = vmatprep.subr.bf16.mxu1 %v3859_v0  ;;  %v4598_v60 = vld [vmem:[%s4888_s5 + $0x78] sm:$0xff]  }
 0x220   :  { %2984 = vmatprep.subr.bf16.mxu0 %v4270_v61  ;;  %v818_v61 = vpack.c.bf16 %v817_v59, %v816_v58  ;;  %v2807_v19 = vpop.f32.mrf.mxu0 }
 0x221   :  { %v2808_v35 = vadd.f32 %v2807_v19, %v2806_v4 }
 0x222   :  { %3473 = vmatpush3.bf16.msra.mxu1 %v4359_v14  ;;  %v2809_v22 = vpop.f32.mrf.mxu0 }
 0x223   :  { %2985 = vmatpush3.bf16.msra.mxu0 %v4277_v62  ;;  %3474 = vmatprep.subr.bf16.mxu1 %v3859_v0  ;;  %v4607_v62 = vld [vmem:[%s4888_s5 + $0x38] sm:$0xff]   ;;  %v1160_v40 = vadd.f32 %v2808_v35, %v4773_v33 }
 0x224   :  { %2986 = vmatprep.subr.bf16.mxu0 %v4284_v63  ;;  %v4612_v63 = vld [vmem:[%s4888_s5 + $0x70] sm:$0xff]   ;;  %v2810_v24 = vpop.f32.mrf.mxu0 }
 0x225   :  { %v2811_v31 = vadd.f32 %v2810_v24, %v2809_v22 }
 0x226   :  { %3475 = vmatpush3.bf16.msra.mxu1 %v4368_v15 }
 0x227   :  { %2987 = vmatpush3.bf16.msra.mxu0 %v4291_v1  ;;  %3476 = vmatprep.subr.bf16.mxu1 %v3859_v0  ;;  %v4622_v1 = vld [vmem:[%s4888_s5 + $0x30] sm:$0xff]   ;;  %v1163_v37 = vadd.f32 %v2811_v31, %v4773_v33 }
 0x228   :  { %2988 = vmatprep.subr.bf16.mxu0 %v4298_v3  ;;  %v4628_v3 = vld [vmem:[%s4888_s5 + $0x68] sm:$0xff]  }
 0x22a   :  { %3477 = vmatpush3.bf16.msra.mxu1 %v4377_v16 }
 0x22b   :  { %2989 = vmatpush3.bf16.msra.mxu0 %v4305_v6  ;;  %3478 = vmatprep.subr.bf16.mxu1 %v3859_v0  ;;  %v4636_v6 = vld [vmem:[%s4888_s5 + $0x28] sm:$0xff]  }
 0x22c   :  { %2990 = vmatprep.subr.bf16.mxu0 %v4316_v8  ;;  %v4650_v8 = vld [vmem:[%s4888_s5 + $0x20] sm:$0xff]  }
 0x22e   :  { %3479 = vmatpush3.bf16.msra.mxu1 %v4386_v17 }
 0x22f   :  { %2991 = vmatpush3.bf16.msra.mxu0 %v4324_v9  ;;  %3484 = vmatprep.subr.bf16.mxu1 %v3859_v0  ;;  %v4656_v9 = vld [vmem:[%s4888_s5 + $0x58] sm:$0xff]  }
 0x230   :  { %3007 = vmatprep.subr.bf16.mxu0 %v4598_v60 }
 0x231   :  { %3481 = vmatmul.mubr.bf16.vlgmr.msra.gmra.mxu1 %v818_v61 }
 0x232   :  { %1668 = vmatmul.mubr.bf16.vlgmr.msra.gmra.mxu0 %v818_v61  ;;  %3485 = vmatpush3.bf16.msra.mxu1 %v4310_v7  ;;  %v4642_v7 = vld [vmem:[%s4888_s5 + $0x60] sm:$0xff]  }
 0x233   :  { %3486 = vmatprep.subr.bf16.mxu1 %v3859_v0  ;;  %3500 = vmatprep.mubr.msk.bf16.mxu1 %vm3860_vm0, %v3859_v0 }
 0x234   :  { %3008 = vmatpush3.bf16.msra.mxu0 %v4607_v62 }
 0x235   :  { %3009 = vmatprep.subr.bf16.mxu0 %v4612_v63 }
 0x236   :  { %3487 = vmatpush3.bf16.msra.mxu1 %v4330_v10  ;;  %v4664_v10 = vld [vmem:[%s4888_s5 + $0x18] sm:$0xff]  }
 0x237   :  { %3488 = vmatprep.subr.bf16.mxu1 %v3859_v0 }
 0x238   :  { %3010 = vmatpush3.bf16.msra.mxu0 %v4622_v1 }
 0x239   :  { %3011 = vmatprep.subr.bf16.mxu0 %v4628_v3 }
 0x23a   :  { %3489 = vmatpush3.bf16.msra.mxu1 %v4341_v11  ;;  %v4670_v11 = vld [vmem:[%s4888_s5 + $0x50] sm:$0xff]  }
 0x23b   :  { %3490 = vmatprep.subr.bf16.mxu1 %v3859_v0 }
 0x23c   :  { %3012 = vmatpush3.bf16.msra.mxu0 %v4636_v6 }
 0x23d   :  { %3013 = vmatprep.subr.bf16.mxu0 %v4642_v7 }
 0x23e   :  { %3491 = vmatpush3.bf16.msra.mxu1 %v4350_v13  ;;  %v4678_v13 = vld [vmem:[%s4888_s5 + $0x10] sm:$0xff]  }
 0x23f   :  { %3492 = vmatprep.subr.bf16.mxu1 %v3859_v0 }
 0x240   :  { %3014 = vmatpush3.bf16.msra.mxu0 %v4650_v8 }
 0x241   :  { %3015 = vmatprep.subr.bf16.mxu0 %v4656_v9 }
 0x242   :  { %3493 = vmatpush3.bf16.msra.mxu1 %v4359_v14  ;;  %v917_v14 = vadd.f32 %v4195_v43, %v4565_v46  ;;  %v924_v43 = vmax.f32 %v920_v49, 0.0 }
 0x243   :  { %3494 = vmatprep.subr.bf16.mxu1 %v3859_v0 }
 0x244   :  { %3016 = vmatpush3.bf16.msra.mxu0 %v4664_v10  ;;  %v923_v51 = vmax.f32 %v917_v14, 0.0 }
 0x245   :  { %3017 = vmatprep.subr.bf16.mxu0 %v4670_v11 }
 0x246   :  { %3495 = vmatpush3.bf16.msra.mxu1 %v4368_v15  ;;  %v4702_v15 = vld [vmem:[%s4888_s5 + $0x40] sm:$0xff]  }
 0x247   :  { %3496 = vmatprep.subr.bf16.mxu1 %v3859_v0 }
 0x248   :  { %3018 = vmatpush3.bf16.msra.mxu0 %v4678_v13 }
 0x249   :  { %3019 = vmatprep.subr.bf16.mxu0 %v4684_v48 }
 0x24a   :  { %3497 = vmatpush3.bf16.msra.mxu1 %v4377_v16  ;;  %v925_v16 = vpack.c.bf16 %v924_v43, %v923_v51 }
 0x24b   :  { %3498 = vmatprep.subr.bf16.mxu1 %v3859_v0 }
 0x24c   :  { %3020 = vmatpush3.bf16.msra.mxu0 %v4696_v50 }
 0x24d   :  { %3021 = vmatprep.subr.bf16.mxu0 %v4702_v15 }
 0x24e   :  { %3499 = vmatpush3.bf16.msra.mxu1 %v4386_v17  ;;  %v4726_v17 = vld [vmem:[%s4888_s5 + $0xb0] sm:$0xff]  }
 0x24f   :  { %3504 = vmatprep.subr.bf16.mxu1 %v3859_v0 }
 0x250   :  { %3022 = vmatpush3.bf16.msra.mxu0 %v4710_v52 }
 0x251   :  { %3501 = vmatmul.mubr.bf16.vlgmr.msra.gmra.mxu1 %v925_v16  ;;  %v1200_v2 = vpop.f32.mrf.mxu1  ;;  %3038 = vmatprep.subr.bf16.mxu0 %v4598_v60 }
 0x252   :  { %3505 = vmatpush3.bf16.msra.mxu1 %v4717_v55  ;;  %3520 = vmatprep.mubr.msk.bf16.mxu1 %vm3860_vm0, %v3859_v0  ;;  %v2837_v25 = vpop.f32.mrf.mxu0  ;;  %v1201_v46 = vadd.f32 %v1200_v2, %v1160_v40 }
 0x253   :  { %v3382_v5 = vpop.f32.mrf.mxu1  ;;  %3506 = vmatprep.subr.bf16.mxu1 %v3859_v0 }
 0x254   :  { %v2838_v27 = vpop.f32.mrf.mxu0  ;;  %v1207_v59 = vmax.f32 %v1201_v46, 0.0 }
 0x255   :  { %v1203_v12 = vpop.f32.mrf.mxu1  ;;  %v2839_v34 = vadd.f32 %v2838_v27, %v2837_v25 }
 0x256   :  { %3507 = vmatpush3.bf16.msra.mxu1 %v4726_v17  ;;  %v2840_v29 = vpop.f32.mrf.mxu0  ;;  %v1204_v41 = vadd.f32 %v1203_v12, %v1163_v37 }
 0x257   :  { %v3383_v20 = vpop.f32.mrf.mxu1  ;;  %3508 = vmatprep.subr.bf16.mxu1 %v3859_v0  ;;  %v1245_v39 = vadd.f32 %v2839_v34, %v4773_v33 }
 0x258   :  { %v2841_v32 = vpop.f32.mrf.mxu0  ;;  %v1208_v54 = vmax.f32 %v1204_v41, 0.0 }
 0x259   :  { %v2842_v36 = vadd.f32 %v2841_v32, %v2840_v29 }
 0x25a   :  { %3509 = vmatpush3.bf16.msra.mxu1 %v4735_v18  ;;  %v1209_v14 = vpack.c.bf16 %v1208_v54, %v1207_v59 }
 0x25b   :  { %3510 = vmatprep.subr.bf16.mxu1 %v3859_v0  ;;  %v1248_v45 = vadd.f32 %v2842_v36, %v4773_v33 }
 0x25e   :  { %3511 = vmatpush3.bf16.msra.mxu1 %v4742_v21 }
 0x25f   :  { %3512 = vmatprep.subr.bf16.mxu1 %v3859_v0 }
 0x262   :  { %3513 = vmatpush3.bf16.msra.mxu1 %v4749_v23 }
 0x263   :  { %3514 = vmatprep.subr.bf16.mxu1 %v3859_v0 }
 0x266   :  { %3515 = vmatpush3.bf16.msra.mxu1 %v4756_v26 }
 0x267   :  { %3516 = vmatprep.subr.bf16.mxu1 %v3859_v0 }
 0x26a   :  { %3517 = vmatpush3.bf16.msra.mxu1 %v4763_v28 }
 0x26b   :  { %3518 = vmatprep.subr.bf16.mxu1 %v3859_v0 }
 0x26e   :  { %3519 = vmatpush3.bf16.msra.mxu1 %v4770_v30 }
 0x26f   :  { %3524 = vmatprep.subr.bf16.mxu1 %v3859_v0 }
 0x271   :  { %v1285_v38 = vpop.f32.mrf.mxu1 }
 0x272   :  { %v1286_v44 = vadd.f32 %v1285_v38, %v1245_v39  ;;  %v2868_v49 = vpop.f32.mrf.mxu0 }
 0x273   :  { %v3402_v42 = vpop.f32.mrf.mxu1 }
 0x274   :  { %v1292_v57 = vmax.f32 %v1286_v44, 0.0  ;;  %v2869_v51 = vpop.f32.mrf.mxu0 }
 0x275   :  { %v1288_v47 = vpop.f32.mrf.mxu1  ;;  %v2870_v2 = vadd.f32 %v2869_v51, %v2868_v49 }
 0x276   :  { %v1289_v53 = vadd.f32 %v1288_v47, %v1248_v45  ;;  %v2871_v43 = vpop.f32.mrf.mxu0 }
 0x277   :  { %v3403_v56 = vpop.f32.mrf.mxu1  ;;  %v1330_v12 = vadd.f32 %v2870_v2, %v4773_v33 }
 0x278   :  { %v1293_v58 = vmax.f32 %v1289_v53, 0.0  ;;  %v2872_v16 = vpop.f32.mrf.mxu0 }
 0x279   :  { %v2873_v4 = vadd.f32 %v2872_v16, %v2871_v43 }
 0x27a   :  { %v1294_v61 = vpack.c.bf16 %v1293_v58, %v1292_v57 }
 0x27b   :  { %v1333_v22 = vadd.f32 %v2873_v4, %v4773_v33 }
 0x27c   :  { %1951 = vmatprep.mubr.bf16.mxu0 %v1294_v61 }
 0x27d   :  { %1952 = vmatmul.mubr.bf16.vlgmr.msra.gmra.mxu0 %v1209_v14 }
 0x27e   :  { %3039 = vmatpush3.bf16.msra.mxu0 %v4607_v62 }
 0x27f   :  { %3040 = vmatprep.subr.bf16.mxu0 %v4612_v63 }
 0x282   :  { %3041 = vmatpush3.bf16.msra.mxu0 %v4622_v1 }
 0x283   :  { %3042 = vmatprep.subr.bf16.mxu0 %v4628_v3 }
 0x286   :  { %3043 = vmatpush3.bf16.msra.mxu0 %v4636_v6 }
 0x287   :  { %3044 = vmatprep.subr.bf16.mxu0 %v4642_v7 }
 0x28a   :  { %3045 = vmatpush3.bf16.msra.mxu0 %v4650_v8 }
 0x28b   :  { %3046 = vmatprep.subr.bf16.mxu0 %v4656_v9 }
 0x28e   :  { %3047 = vmatpush3.bf16.msra.mxu0 %v4664_v10 }
 0x28f   :  { %3048 = vmatprep.subr.bf16.mxu0 %v4670_v11 }
 0x291   :  { %v1370_v5 = vpop.f32.mrf.mxu1 }
 0x292   :  { %3049 = vmatpush3.bf16.msra.mxu0 %v4678_v13  ;;  %v1371_v20 = vadd.f32 %v1370_v5, %v1330_v12  ;;  %v2899_v34 = vpop.f32.mrf.mxu0 }
 0x293   :  { %v3422_v19 = vpop.f32.mrf.mxu1  ;;  %3050 = vmatprep.subr.bf16.mxu0 %v4684_v48 }
 0x294   :  { %v1377_v29 = vmax.f32 %v1371_v20, 0.0  ;;  %v2900_v35 = vpop.f32.mrf.mxu0  ;;  %v3691_v20 = vld [vmem:[#allocation6 + $0x78] sm:$0xff]  }
 0x295   :  { %v1373_v24 = vpop.f32.mrf.mxu1  ;;  %v2901_v37 = vadd.f32 %v2900_v35, %v2899_v34  ;;  %v3698_v35 = vld [vmem:[#allocation6 + $0x20] sm:$0xff]  }
 0x296   :  { %v1374_v25 = vadd.f32 %v1373_v24, %v1333_v22  ;;  %3051 = vmatpush3.bf16.msra.mxu0 %v4696_v50  ;;  %v2902_v36 = vpop.f32.mrf.mxu0  ;;  %v3692_v22 = vld [vmem:[#allocation6 + $0x38] sm:$0xff]   ;;  %v3693_v24 = vld [vmem:[#allocation6 + $0x70] sm:$0xff]  }
 0x297   :  { %v3423_v27 = vpop.f32.mrf.mxu1  ;;  %3052 = vmatprep.subr.bf16.mxu0 %v4702_v15  ;;  %v1415_v40 = vadd.f32 %v2901_v37, %v4773_v33 }
 0x298   :  { %v1378_v31 = vmax.f32 %v1374_v25, 0.0  ;;  %v3695_v27 = vld [vmem:[#allocation6 + $0x68] sm:$0xff]  }
 0x29a   :  { %v1379_v32 = vpack.c.bf16 %v1378_v31, %v1377_v29  ;;  %3053 = vmatpush3.bf16.msra.mxu0 %v4710_v52  ;;  %v3696_v31 = vld [vmem:[#allocation6 + $0x28] sm:$0xff]  }
 0x29b   :  { %3069 = vmatprep.subr.bf16.mxu0 %v4598_v60  ;;  %v2903_v60 = vpop.f32.mrf.mxu0 }
 0x29c   :  { %3521 = vmatmul.mubr.bf16.vlgmr.msra.gmra.mxu1 %v1379_v32  ;;  %v2904_v38 = vadd.f32 %v2903_v60, %v2902_v36  ;;  %v3699_v60 = vld [vmem:[#allocation6 + $0x58] sm:$0xff]  }
 0x29d   :  { %3525 = vmatpush3.bf16.msra.mxu1 %v4717_v55  ;;  %3540 = vmatprep.mubr.msk.bf16.mxu1 %vm3860_vm0, %v3859_v0 }
 0x29e   :  { %3526 = vmatprep.subr.bf16.mxu1 %v3859_v0  ;;  %v1418_v44 = vadd.f32 %v2904_v38, %v4773_v33 }
 0x2a1   :  { %3527 = vmatpush3.bf16.msra.mxu1 %v4726_v17 }
 0x2a2   :  { %3528 = vmatprep.subr.bf16.mxu1 %v3859_v0 }
 0x2a5   :  { %3529 = vmatpush3.bf16.msra.mxu1 %v4735_v18 }
 0x2a6   :  { %3530 = vmatprep.subr.bf16.mxu1 %v3859_v0 }
 0x2a9   :  { %3531 = vmatpush3.bf16.msra.mxu1 %v4742_v21 }
 0x2aa   :  { %3532 = vmatprep.subr.bf16.mxu1 %v3859_v0 }
 0x2ad   :  { %3533 = vmatpush3.bf16.msra.mxu1 %v4749_v23 }
 0x2ae   :  { %3534 = vmatprep.subr.bf16.mxu1 %v3859_v0 }
 0x2b1   :  { %v1455_v39 = vpop.f32.mrf.mxu1  ;;  %3535 = vmatpush3.bf16.msra.mxu1 %v4756_v26 }
 0x2b2   :  { %3536 = vmatprep.subr.bf16.mxu1 %v3859_v0  ;;  %v1456_v42 = vadd.f32 %v1455_v39, %v1415_v40  ;;  %v2930_v57 = vpop.f32.mrf.mxu0  ;;  %v3700_v40 = vld [vmem:[#allocation6 + $0x18] sm:$0xff]  }
 0x2b3   :  { %v3442_v41 = vpop.f32.mrf.mxu1 }
 0x2b4   :  { %v1462_v53 = vmax.f32 %v1456_v42, 0.0  ;;  %v2931_v58 = vpop.f32.mrf.mxu0 }
 0x2b5   :  { %v1458_v45 = vpop.f32.mrf.mxu1  ;;  %3537 = vmatpush3.bf16.msra.mxu1 %v4763_v28  ;;  %v2932_v14 = vadd.f32 %v2931_v58, %v2930_v57  ;;  %v3702_v57 = vld [vmem:[#allocation6 + $0x10] sm:$0xff]   ;;  %v3703_v58 = vld [vmem:[#allocation6 + $0x48] sm:$0xff]  }
 0x2b6   :  { %v1459_v46 = vadd.f32 %v1458_v45, %v1418_v44  ;;  %3538 = vmatprep.subr.bf16.mxu1 %v3859_v0  ;;  %v2933_v59 = vpop.f32.mrf.mxu0 }
 0x2b7   :  { %v3443_v47 = vpop.f32.mrf.mxu1 }
 0x2b8   :  { %v1463_v54 = vmax.f32 %v1459_v46, 0.0  ;;  %v2934_v61 = vpop.f32.mrf.mxu0 }
 0x2b9   :  { %3539 = vmatpush3.bf16.msra.mxu1 %v4770_v30 }
 0x2ba   :  { %v1464_v56 = vpack.c.bf16 %v1463_v54, %v1462_v53  ;;  %3544 = vmatprep.subr.bf16.mxu1 %v3859_v0 }
 0x2bc   :  { %2036 = vmatprep.mubr.bf16.mxu0 %v1464_v56  ;;  %v3701_v56 = vld [vmem:[#allocation6 + $0x50] sm:$0xff]  }
 0x2bd   :  { %2037 = vmatmul.mubr.bf16.vlgmr.msra.gmra.mxu0 %v1379_v32 }
 0x2be   :  { %3070 = vmatpush3.bf16.msra.mxu0 %v4607_v62  ;;  %v2935_v62 = vadd.f32 %v2934_v61, %v2933_v59  ;;  %v3704_v59 = vld [vmem:[#allocation6 + $0x8] sm:$0xff]   ;;  %v3706_v61 = vld [vmem:[#allocation6] sm:$0xff]  }
 0x2bf   :  { %3071 = vmatprep.subr.bf16.mxu0 %v4612_v63 }
 0x2c2   :  { %3072 = vmatpush3.bf16.msra.mxu0 %v4622_v1  ;;  %v1500_v1 = vadd.f32 %v2932_v14, %v4773_v33  ;;  %v3707_v14 = vld [vmem:[#allocation6 + $0xb8] sm:$0xff]  }
 0x2c3   :  { %3073 = vmatprep.subr.bf16.mxu0 %v4628_v3 }
 0x2c6   :  { %3074 = vmatpush3.bf16.msra.mxu0 %v4636_v6 }
 0x2c7   :  { %3075 = vmatprep.subr.bf16.mxu0 %v4642_v7  ;;  %v1503_v7 = vadd.f32 %v2935_v62, %v4773_v33  ;;  %v3708_v62 = vld [vmem:[#allocation6 + $0xb0] sm:$0xff]  }
 0x2ca   :  { %3076 = vmatpush3.bf16.msra.mxu0 %v4650_v8 }
 0x2cb   :  { %3077 = vmatprep.subr.bf16.mxu0 %v4656_v9 }
 0x2ce   :  { %3078 = vmatpush3.bf16.msra.mxu0 %v4664_v10 }
 0x2cf   :  { %3079 = vmatprep.subr.bf16.mxu0 %v4670_v11 }
 0x2d1   :  { %v1540_v63 = vpop.f32.mrf.mxu1 }
 0x2d2   :  { %3080 = vmatpush3.bf16.msra.mxu0 %v4678_v13  ;;  %v1541_v6 = vadd.f32 %v1540_v63, %v1500_v1  ;;  %v2961_v13 = vpop.f32.mrf.mxu0  ;;  %v3709_v63 = vld [vmem:[#allocation6 + $0xa8] sm:$0xff]  }
 0x2d3   :  { %v3462_v3 = vpop.f32.mrf.mxu1  ;;  %3081 = vmatprep.subr.bf16.mxu0 %v4684_v48 }
 0x2d4   :  { %v1547_v10 = vmax.f32 %v1541_v6, 0.0  ;;  %v2962_v48 = vpop.f32.mrf.mxu0  ;;  %v3710_v3 = vld [vmem:[#allocation6 + $0xa0] sm:$0xff]  }
 0x2d5   :  { %v1543_v8 = vpop.f32.mrf.mxu1 }
 0x2d6   :  { %v1544_v9 = vadd.f32 %v1543_v8, %v1503_v7  ;;  %3082 = vmatpush3.bf16.msra.mxu0 %v4696_v50  ;;  %v2964_v50 = vpop.f32.mrf.mxu0  ;;  %v3711_v7 = vld [vmem:[#allocation6 + $0x98] sm:$0xff]  }
 0x2d7   :  { %v3463_v49 = vpop.f32.mrf.mxu1  ;;  %3083 = vmatprep.subr.bf16.mxu0 %v4702_v15 }
 0x2d8   :  { %v1548_v11 = vmax.f32 %v1544_v9, 0.0  ;;  %v2965_v15 = vpop.f32.mrf.mxu0 }
 0x2da   :  { %v1549_v51 = vpack.c.bf16 %v1548_v11, %v1547_v10  ;;  %3084 = vmatpush3.bf16.msra.mxu0 %v4710_v52  ;;  %v2963_v52 = vadd.f32 %v2962_v48, %v2961_v13  ;;  %v2633_v10 = vld [vmem:[#allocation4] ss:$0 sm:$0xff]  ;;  %v3712_v11 = vld [vmem:[#allocation6 + $0x90] sm:$0xff]  }
 0x2db   :  { %3100 = vmatprep.subr.bf16.mxu0 %v3691_v20 }
 0x2dc   :  { %3541 = vmatmul.mubr.bf16.vlgmr.msra.gmra.mxu1 %v1549_v51  ;;  %v1585_v43 = vadd.f32 %v2963_v52, %v4773_v33 }
 0x2dd   :  { %3545 = vmatpush3.bf16.msra.mxu1 %v4717_v55  ;;  %3560 = vmatprep.mubr.msk.bf16.mxu1 %vm3860_vm0, %v3859_v0  ;;  %v2966_v55 = vadd.f32 %v2965_v15, %v2964_v50  ;;  %v3713_v15 = vld [vmem:[#allocation6 + $0x88] sm:$0xff]  }
 0x2de   :  { %3546 = vmatprep.subr.bf16.mxu1 %v3859_v0 }
 0x2e1   :  { %3547 = vmatpush3.bf16.msra.mxu1 %v4726_v17 }
 0x2e2   :  { %3548 = vmatprep.subr.bf16.mxu1 %v3859_v0 }
 0x2e5   :  { %3549 = vmatpush3.bf16.msra.mxu1 %v4735_v18 }
 0x2e6   :  { %3550 = vmatprep.subr.bf16.mxu1 %v3859_v0 }
 0x2e9   :  { %3551 = vmatpush3.bf16.msra.mxu1 %v4742_v21  ;;  %v1588_v21 = vadd.f32 %v2966_v55, %v4773_v33 }
 0x2ea   :  { %3552 = vmatprep.subr.bf16.mxu1 %v3859_v0 }
 0x2ed   :  { %3553 = vmatpush3.bf16.msra.mxu1 %v4749_v23 }
 0x2ee   :  { %3554 = vmatprep.subr.bf16.mxu1 %v3859_v0 }
 0x2f1   :  { %v1625_v17 = vpop.f32.mrf.mxu1  ;;  %3555 = vmatpush3.bf16.msra.mxu1 %v4756_v26 }
 0x2f2   :  { %3556 = vmatprep.subr.bf16.mxu1 %v3859_v0  ;;  %v1626_v16 = vadd.f32 %v1625_v17, %v1585_v43  ;;  %v2992_v19 = vpop.f32.mrf.mxu0 }
 0x2f3   :  { %v3482_v18 = vpop.f32.mrf.mxu1 }
 0x2f4   :  { %v1632_v5 = vmax.f32 %v1626_v16, 0.0  ;;  %v2993_v25 = vpop.f32.mrf.mxu0  ;;  %v3714_v16 = vld [vmem:[#allocation6 + $0x80] sm:$0xff]  }
 0x2f5   :  { %v1628_v2 = vpop.f32.mrf.mxu1  ;;  %3557 = vmatpush3.bf16.msra.mxu1 %v4763_v28  ;;  %v3694_v28 = vld [vmem:[#allocation6 + $0x30] sm:$0xff]   ;;  %v2994_v34 = vadd.f32 %v2993_v25, %v2992_v19 }
 0x2f6   :  { %v1629_v4 = vadd.f32 %v1628_v2, %v1588_v21  ;;  %3558 = vmatprep.subr.bf16.mxu1 %v3859_v0  ;;  %v2995_v29 = vpop.f32.mrf.mxu0 }
 0x2f7   :  { %v3483_v23 = vpop.f32.mrf.mxu1  ;;  %v1670_v38 = vadd.f32 %v2994_v34, %v4773_v33 }
 0x2f8   :  { %v1633_v12 = vmax.f32 %v1629_v4, 0.0  ;;  %v2996_v32 = vpop.f32.mrf.mxu0 }
 0x2f9   :  { %3559 = vmatpush3.bf16.msra.mxu1 %v4770_v30  ;;  %v3697_v30 = vld [vmem:[#allocation6 + $0x60] sm:$0xff]   ;;  %v2997_v36 = vadd.f32 %v2996_v32, %v2995_v29 }
 0x2fa   :  { %v1634_v26 = vpack.c.bf16 %v1633_v12, %v1632_v5  ;;  %3564 = vmatprep.subr.bf16.mxu1 %v3859_v0 }
 0x2fb   :  { %v1673_v42 = vadd.f32 %v2997_v36, %v4773_v33  ;;  %v3705_v33 = vld [vmem:[#allocation6 + $0x40] sm:$0xff]  }
 0x2fc   :  { %2121 = vmatprep.mubr.bf16.mxu0 %v1634_v26 }
 0x2fd   :  { %2122 = vmatmul.mubr.bf16.vlgmr.msra.gmra.mxu0 %v1549_v51 }
 0x2fe   :  { %3101 = vmatpush3.bf16.msra.mxu0 %v3692_v22 }
 0x2ff   :  { %3102 = vmatprep.subr.bf16.mxu0 %v3693_v24 }
 0x302   :  { %3103 = vmatpush3.bf16.msra.mxu0 %v3694_v28 }
 0x303   :  { %3104 = vmatprep.subr.bf16.mxu0 %v3695_v27 }
 0x306   :  { %3105 = vmatpush3.bf16.msra.mxu0 %v3696_v31 }
 0x307   :  { %3106 = vmatprep.subr.bf16.mxu0 %v3697_v30 }
 0x30a   :  { %3107 = vmatpush3.bf16.msra.mxu0 %v3698_v35 }
 0x30b   :  { %3108 = vmatprep.subr.bf16.mxu0 %v3699_v60 }
 0x30e   :  { %3109 = vmatpush3.bf16.msra.mxu0 %v3700_v40 }
 0x30f   :  { %3110 = vmatprep.subr.bf16.mxu0 %v3701_v56 }
 0x311   :  { %v1710_v37 = vpop.f32.mrf.mxu1 }
 0x312   :  { %v1711_v41 = vadd.f32 %v1710_v37, %v1670_v38  ;;  %3111 = vmatpush3.bf16.msra.mxu0 %v3702_v57 }
 0x313   :  { %v3502_v39 = vpop.f32.mrf.mxu1  ;;  %3112 = vmatprep.subr.bf16.mxu0 %v3703_v58 }
 0x314   :  { %v1717_v47 = vmax.f32 %v1711_v41, 0.0 }
 0x315   :  { %v1713_v44 = vpop.f32.mrf.mxu1 }
 0x316   :  { %v1714_v45 = vadd.f32 %v1713_v44, %v1673_v42  ;;  %3113 = vmatpush3.bf16.msra.mxu0 %v3704_v59  ;;  %v3715_v59 = vld [vmem:[#allocation9 + $0x38] sm:$0xff]  }
 0x317   :  { %v3503_v46 = vpop.f32.mrf.mxu1  ;;  %3114 = vmatprep.subr.bf16.mxu0 %v3705_v33  ;;  %v3716_v33 = vld [vmem:[#allocation9 + $0x30] sm:$0xff]  }
 0x318   :  { %v1718_v53 = vmax.f32 %v1714_v45, 0.0 }
 0x31a   :  { %v1719_v54 = vpack.c.bf16 %v1718_v53, %v1717_v47  ;;  %3115 = vmatpush3.bf16.msra.mxu0 %v3706_v61  ;;  %v3717_v61 = vld [vmem:[#allocation9 + $0x28] sm:$0xff]  }
 0x31b   :  { %3584 = vmatprep.subr.bf16.mxu0 %v3859_v0 }
 0x31c   :  { %3561 = vmatmul.mubr.bf16.vlgmr.msra.gmra.mxu1 %v1719_v54 }
 0x31d   :  { %3580 = vmatprep.mubr.msk.bf16.mxu1 %vm3860_vm0, %v3859_v0  ;;  %3565 = vmatpush3.bf16.msra.mxu1 %v3707_v14  ;;  %v3718_v14 = vld [vmem:[#allocation9 + $0x20] sm:$0xff]  }
 0x31e   :  { %3566 = vmatprep.subr.bf16.mxu1 %v3859_v0 }
 0x321   :  { %3567 = vmatpush3.bf16.msra.mxu1 %v3708_v62  ;;  %v3719_v62 = vld [vmem:[#allocation9 + $0x18] sm:$0xff]  }
 0x322   :  { %3568 = vmatprep.subr.bf16.mxu1 %v3859_v0 }
 0x325   :  { %3569 = vmatpush3.bf16.msra.mxu1 %v3709_v63  ;;  %v3720_v63 = vld [vmem:[#allocation9 + $0x10] sm:$0xff]  }
 0x326   :  { %3570 = vmatprep.subr.bf16.mxu1 %v3859_v0 }
 0x329   :  { %3571 = vmatpush3.bf16.msra.mxu1 %v3710_v3  ;;  %v3722_v3 = vld [vmem:[#allocation9] sm:$0xff]  }
 0x32a   :  { %3572 = vmatprep.subr.bf16.mxu1 %v3859_v0 }
 0x32d   :  { %3573 = vmatpush3.bf16.msra.mxu1 %v3711_v7 }
 0x32e   :  { %3574 = vmatprep.subr.bf16.mxu1 %v3859_v0 }
 0x331   :  { %3575 = vmatpush3.bf16.msra.mxu1 %v3712_v11 }
 0x332   :  { %3576 = vmatprep.subr.bf16.mxu1 %v3859_v0 }
 0x335   :  { %3577 = vmatpush3.bf16.msra.mxu1 %v3713_v15 }
 0x336   :  { %3578 = vmatprep.subr.bf16.mxu1 %v3859_v0 }
 0x339   :  { %3579 = vmatpush3.bf16.msra.mxu1 %v3714_v16  ;;  %v2683_v16 = vld [vmem:[#allocation10] ss:$0 sm:$0xff] }
 0x33d   :  { %v3023_v1 = vpop.f32.mrf.mxu0 }
 0x33f   :  { %v3024_v6 = vpop.f32.mrf.mxu0 }
 0x340   :  { %v3025_v49 = vadd.f32 %v3024_v6, %v3023_v1  ;;  %v3721_v1 = vld [vmem:[#allocation9 + $0x8] sm:$0xff]  }
 0x341   :  { %v3026_v8 = vpop.f32.mrf.mxu0 }
 0x342   :  { %v1954_v48 = vadd.f32 %v3025_v49, %v2633_v10 }
 0x343   :  { %v3027_v9 = vpop.f32.mrf.mxu0 }
 0x344   :  { %v3028_v51 = vadd.f32 %v3027_v9, %v3026_v8 }
 0x346   :  { %v1957_v55 = vadd.f32 %v3028_v51, %v2633_v10 }
 0x35c   :  { %v1994_v13 = vpop.f32.mrf.mxu1 }
 0x35d   :  { %v1995_v52 = vadd.f32 %v1994_v13, %v1954_v48 }
 0x35e   :  { %v3522_v50 = vpop.f32.mrf.mxu1 }
 0x35f   :  { %v2001_v21 = vmax.f32 %v1995_v52, 0.0 }
 0x360   :  { %v1997_v17 = vpop.f32.mrf.mxu1 }
 0x361   :  { %v1998_v43 = vadd.f32 %v1997_v17, %v1957_v55 }
 0x362   :  { %v3523_v18 = vpop.f32.mrf.mxu1 }
 0x363   :  { %v2002_v2 = vmax.f32 %v1998_v43, 0.0 }
 0x365   :  { %v2003_v4 = vpack.c.bf16 %v2002_v2, %v2001_v21 }
 0x37d   :  { %v3054_v23 = vpop.f32.mrf.mxu0 }
 0x37f   :  { %v3055_v5 = vpop.f32.mrf.mxu0 }
 0x380   :  { %v3056_v19 = vadd.f32 %v3055_v5, %v3054_v23 }
 0x381   :  { %v3057_v12 = vpop.f32.mrf.mxu0 }
 0x382   :  { %v2039_v24 = vadd.f32 %v3056_v19, %v2633_v10 }
 0x383   :  { %v3058_v26 = vpop.f32.mrf.mxu0 }
 0x384   :  { %v3059_v20 = vadd.f32 %v3058_v26, %v3057_v12 }
 0x386   :  { %v2042_v27 = vadd.f32 %v3059_v20, %v2633_v10 }
 0x39c   :  { %v2079_v22 = vpop.f32.mrf.mxu1 }
 0x39d   :  { %v2080_v28 = vadd.f32 %v2079_v22, %v2039_v24 }
 0x39e   :  { %v3542_v25 = vpop.f32.mrf.mxu1 }
 0x39f   :  { %v2086_v32 = vmax.f32 %v2080_v28, 0.0 }
 0x3a0   :  { %v2082_v29 = vpop.f32.mrf.mxu1 }
 0x3a1   :  { %v2083_v31 = vadd.f32 %v2082_v29, %v2042_v27 }
 0x3a2   :  { %v3543_v30 = vpop.f32.mrf.mxu1 }
 0x3a3   :  { %v2087_v34 = vmax.f32 %v2083_v31, 0.0 }
 0x3a5   :  { %v2088_v35 = vpack.c.bf16 %v2087_v34, %v2086_v32 }
 0x3a7   :  { %2405 = vmatprep.mubr.bf16.mxu0 %v2088_v35 }
 0x3a8   :  { %2406 = vmatmul.mubr.bf16.vlgmr.msra.gmra.mxu0 %v2003_v4 }
 0x3a9   :  { %3600 = vmatprep.mubr.msk.bf16.mxu0 %vm3860_vm0, %v3859_v0  ;;  %3585 = vmatpush3.bf16.msra.mxu0 %v3715_v59 }
 0x3aa   :  { %3586 = vmatprep.subr.bf16.mxu0 %v3859_v0 }
 0x3ad   :  { %3587 = vmatpush3.bf16.msra.mxu0 %v3716_v33 }
 0x3ae   :  { %3588 = vmatprep.subr.bf16.mxu0 %v3859_v0 }
 0x3b1   :  { %3589 = vmatpush3.bf16.msra.mxu0 %v3717_v61 }
 0x3b2   :  { %3590 = vmatprep.subr.bf16.mxu0 %v3859_v0 }
 0x3b5   :  { %3591 = vmatpush3.bf16.msra.mxu0 %v3718_v14 }
 0x3b6   :  { %3592 = vmatprep.subr.bf16.mxu0 %v3859_v0 }
 0x3b9   :  { %3593 = vmatpush3.bf16.msra.mxu0 %v3719_v62 }
 0x3ba   :  { %3594 = vmatprep.subr.bf16.mxu0 %v3859_v0 }
 0x3bd   :  { %v3085_v36 = vpop.f32.mrf.mxu0  ;;  %3595 = vmatpush3.bf16.msra.mxu0 %v3720_v63 }
 0x3be   :  { %3596 = vmatprep.subr.bf16.mxu0 %v3859_v0 }
 0x3bf   :  { %v3086_v60 = vpop.f32.mrf.mxu0 }
 0x3c0   :  { %v3087_v39 = vadd.f32 %v3086_v60, %v3085_v36 }
 0x3c1   :  { %v3088_v37 = vpop.f32.mrf.mxu0  ;;  %3597 = vmatpush3.bf16.msra.mxu0 %v3721_v1 }
 0x3c2   :  { %v2124_v42 = vadd.f32 %v3087_v39, %v2633_v10  ;;  %3598 = vmatprep.subr.bf16.mxu0 %v3859_v0 }
 0x3c3   :  { %v3089_v38 = vpop.f32.mrf.mxu0 }
 0x3c4   :  { %v3090_v40 = vadd.f32 %v3089_v38, %v3088_v37 }
 0x3c5   :  { %3599 = vmatpush3.bf16.msra.mxu0 %v3722_v3 }
 0x3c6   :  { %v2127_v46 = vadd.f32 %v3090_v40, %v2633_v10  ;;  %v2658_v10 = vld [vmem:[#allocation7] ss:$0 sm:$0xff] }
 0x3dc   :  { %v2164_v41 = vpop.f32.mrf.mxu1 }
 0x3dd   :  { %v2165_v45 = vadd.f32 %v2164_v41, %v2124_v42 }
 0x3de   :  { %v3562_v44 = vpop.f32.mrf.mxu1 }
 0x3df   :  { %v2171_v56 = vmax.f32 %v2165_v45, 0.0 }
 0x3e0   :  { %v2167_v47 = vpop.f32.mrf.mxu1 }
 0x3e1   :  { %v2168_v53 = vadd.f32 %v2167_v47, %v2127_v46 }
 0x3e2   :  { %v3563_v54 = vpop.f32.mrf.mxu1 }
 0x3e3   :  { %v2172_v57 = vmax.f32 %v2168_v53, 0.0 }
 0x3e5   :  { %v2173_v58 = vpack.c.bf16 %v2172_v57, %v2171_v56 }
 0x3e7   :  { %3581 = vmatmul.mubr.bf16.vlgmr.msra.gmra.mxu1 %v2173_v58 }
 0x468   :  { %v3116_v6 = vpop.f32.mrf.mxu0 }
 0x46a   :  { %v3117_v7 = vpop.f32.mrf.mxu0 }
 0x46b   :  { %v3118_v49 = vadd.f32 %v3117_v7, %v3116_v6 }
 0x46c   :  { %v3119_v8 = vpop.f32.mrf.mxu0 }
 0x46d   :  { %v2408_v13 = vadd.f32 %v3118_v49, %v2658_v10 }
 0x46e   :  { %v3120_v9 = vpop.f32.mrf.mxu0 }
 0x46f   :  { %v3121_v11 = vadd.f32 %v3120_v9, %v3119_v8 }
 0x471   :  { %v2411_v15 = vadd.f32 %v3121_v11, %v2658_v10 }
 0x4a7   :  { %v2448_v51 = vpop.f32.mrf.mxu1 }
 0x4a8   :  { %v2449_v50 = vadd.f32 %v2448_v51, %v2408_v13 }
 0x4a9   :  { %v3582_v48 = vpop.f32.mrf.mxu1 }
 0x4aa   :  { %v2455_v43 = vmax.f32 %v2449_v50, 0.0 }
 0x4ab   :  { %v2451_v52 = vpop.f32.mrf.mxu1 }
 0x4ac   :  { %v2452_v55 = vadd.f32 %v2451_v52, %v2411_v15 }
 0x4ad   :  { %v3583_v17 = vpop.f32.mrf.mxu1 }
 0x4ae   :  { %v2456_v18 = vmax.f32 %v2452_v55, 0.0 }
 0x4b0   :  { %v2457_v0 = vpack.c.bf16 %v2456_v18, %v2455_v43 }
 0x4b2   :  { %3601 = vmatmul.mubr.bf16.vlgmr.msra.gmra.mxu0 %v2457_v0 }
 0x572   :  { %v2563_v21 = vpop.f32.mrf.mxu0 }
 0x573   :  { %v2564_v2 = vadd.f32 %v2683_v16, %v2563_v21 }
 0x574   :  { %v3602_v4 = vpop.f32.mrf.mxu0 }
 0x575   :  { %2570 = vst [vmem:[%s4894_s11] sm:$0xff] %v2564_v2 }
 0x576   :  { %v2566_v23 = vpop.f32.mrf.mxu0 }
 0x577   :  { %v2567_v5 = vadd.f32 %v2683_v16, %v2566_v23 }
 0x578   :  { %v3603_v12 = vpop.f32.mrf.mxu0 }
 0x579   :  { %2571 = vst [vmem:[%s4894_s11 + $0x8] sm:$0xff] %v2567_v5 }
 0x57a   :  { %2576 = vsyncpa [#allocation3], 1 }
 0x57b   :  { %2577 = vsyncpa [#allocation5], 1 }
 0x57c   :  { %2578 = vsyncpa [#allocation8], 1 }
 0x57d   :  { %2579 = vsyncpa [#allocation11], 1 }

</bundles_post_ra>
